<compile_context>
chip_gen: v7x
topology: tpu7x:2x2x1
jax: 0.10.0
libtpu: 0.0.40
codegen_flags: <defaults>
</compile_context>

<pallas_src>
import functools
import math

import jax
import jax.numpy as jnp
from jax.experimental import pallas as pl
from jax.experimental.pallas import tpu as pltpu

LN_EPS = 1e-12

# ----------------------------- model dimensions ------------------------------
HIDDEN = 128          # vln_bert.config.hidden_size (small synthetic value)
ANGLE = 64            # args.angle_feat_size
VIS = 256             # raw visual feature width
FEATURE = VIS + ANGLE # "feature_size" in the module (2048+128 in the original)
B = 2                 # batch
L = 8                 # sentence length (tokens)
N_CAND = 8            # candidate directions
N_OBJ = 8             # object proposals

# Rows of the stacked (12, H) bias/gamma/beta block.
_ASP_B, _ALN_G, _ALN_B = 0, 1, 2
_IMG_B, _CLN_G, _CLN_B = 3, 4, 5
_OBJ_B, _OLN_G, _OLN_B = 6, 7, 8
_SP_B, _SLN_G, _SLN_B = 9, 10, 11


# ------------------------------ fused kernel ---------------------------------
def _vlnbert_visual_kernel(
    vec_ref, opeb_ref,
    w_asp_s_ref, w_asp_a_ref, w_img_ref, w_ope_ref,
    w_obj_v_ref, w_obj_p_ref, w_obj_a_ref,
    w_sp_h_ref, w_sp_v_ref,
    sent_ref, act_ref, cand_ref, obj_ref, objpos_ref,
    vmask_ref, omask_ref,
    state_ref, logit_ref, logit_obj_ref,
    *, eps,
):
    f32 = jnp.float32
    Bq, Nc = vmask_ref.shape
    No = omask_ref.shape[1]
    H = w_img_ref.shape[1]
    VIS_ = w_obj_v_ref.shape[0]

    vec = vec_ref[...]                                   # (12, H)

    def ln(x, gi, bi):
        # BertLayerNorm: TF-style, epsilon inside the sqrt. Stats in f32.
        u = jnp.mean(x, axis=-1, keepdims=True)
        s = jnp.mean(jnp.square(x - u), axis=-1, keepdims=True)
        return vec[gi:gi + 1, :] * ((x - u) * jax.lax.rsqrt(s + eps)) + vec[bi:bi + 1, :]

    # NOTE: all matmuls kept in f32 here — at these toy dims the kernel is
    # launch-bound and the MXU is idle.  At production dims (FEATURE~2176, H=768)
    # cast the dot operands to bfloat16 (keep preferred_element_type=f32 and the
    # LN / tanh chain in f32) for v6e/v7x throughput and halved weight DMA.

    # (1) state_with_action = action_LN(tanh(cat(sentence[:,0], action) @ W + b))
    #     -- concat replaced by split-weight partial matmuls.
    sent0 = sent_ref[...][:, 0, :].astype(f32)           # (B, H)
    act = act_ref[...].astype(f32)                       # (B, A)
    x = jnp.dot(sent0, w_asp_s_ref[...], preferred_element_type=f32)
    x = x + jnp.dot(act, w_asp_a_ref[...], preferred_element_type=f32)
    h_t = ln(jnp.tanh(x + vec[_ASP_B:_ASP_B + 1, :]), _ALN_G, _ALN_B)   # (B, H)

    # (2) cand_feats_embed = cand_LN(img_projection(cand_feats))
    cand = cand_ref[...].astype(f32)                     # (B*Nc, F)
    c = jnp.dot(cand, w_img_ref[...], preferred_element_type=f32) + vec[_IMG_B:_IMG_B + 1, :]
    cand_e = ln(c, _CLN_G, _CLN_B)                       # (B*Nc, H)

    # (3) obj_feats_embed = obj_LN(obj_projection(cat(vis, pos_enc, angle)))
    #     -- concat replaced by three partial matmuls against split weights.
    pos = objpos_ref[...].astype(f32)                    # (B*No, 5)
    pos_e = jnp.dot(pos, w_ope_ref[...], preferred_element_type=f32) + opeb_ref[...]
    obj = obj_ref[...].astype(f32)                       # (B*No, F)
    o = jnp.dot(obj[:, :VIS_], w_obj_v_ref[...], preferred_element_type=f32)
    o = o + jnp.dot(pos_e, w_obj_p_ref[...], preferred_element_type=f32)
    o = o + jnp.dot(obj[:, VIS_:], w_obj_a_ref[...], preferred_element_type=f32)
    obj_e = ln(o + vec[_OBJ_B:_OBJ_B + 1, :], _OLN_G, _OLN_B)           # (B*No, H)

    # (4) single-head cross-attention of the state token over [cand ; obj] tokens.
    # TODO(synk): the pretrained LXMERT/PREVALENT backbone from get_vlnbert_models()
    # is external to this module; it is replaced by this single-head stub.
    cand3 = cand_e.reshape(Bq, Nc, H)
    obj3 = obj_e.reshape(Bq, No, H)
    q3 = h_t[:, None, :]                                 # (B, 1, H)
    scale = 1.0 / math.sqrt(H)
    sc_c = jnp.einsum("bqh,bnh->bqn", q3, cand3,
                      preferred_element_type=f32)[:, 0, :] * scale      # (B, Nc)
    sc_o = jnp.einsum("bqh,bnh->bqn", q3, obj3,
                      preferred_element_type=f32)[:, 0, :] * scale      # (B, No)
    sc_c = jnp.where(vmask_ref[...] > 0.5, sc_c, jnp.float32(-1e9))
    sc_o = jnp.where(omask_ref[...] > 0.5, sc_o, jnp.float32(-1e9))

    m = jnp.maximum(jnp.max(sc_c, axis=-1, keepdims=True),
                    jnp.max(sc_o, axis=-1, keepdims=True))
    e_c = jnp.exp(sc_c - m)
    e_o = jnp.exp(sc_o - m)
    denom = jnp.sum(e_c, axis=-1, keepdims=True) + jnp.sum(e_o, axis=-1, keepdims=True)
    inv = pl.reciprocal(denom, approx=True)
    p_c = e_c * inv
    p_o = e_o * inv
    att = (jnp.einsum("bqn,bnh->bqh", p_c[:, None, :], cand3, preferred_element_type=f32)
           + jnp.einsum("bqn,bnh->bqh", p_o[:, None, :], obj3,
                        preferred_element_type=f32))[:, 0, :]           # (B, H)

    # (5) state_proj = state_LN(cat(h_t, attended_visual) @ W + b)
    #     -- concat replaced by split-weight partial matmuls.
    s = jnp.dot(h_t, w_sp_h_ref[...], preferred_element_type=f32)
    s = s + jnp.dot(att, w_sp_v_ref[...], preferred_element_type=f32)
    state_ref[...] = ln(s + vec[_SP_B:_SP_B + 1, :], _SLN_G, _SLN_B).astype(state_ref.dtype)
    logit_ref[...] = sc_c.astype(logit_ref.dtype)
    logit_obj_ref[...] = sc_o.astype(logit_obj_ref.dtype)


# ------------------------------ pallas wrapper --------------------------------
def _full_spec(shape):
    nd = len(shape)
    return pl.BlockSpec(shape, lambda i, _n=nd: (0,) * _n)


def vlnbert_visual_forward(params, sentence, action_feats, cand_feats, obj_feats,
                           obj_pos, vis_mask, obj_mask):
    Bq, _, H = sentence.shape
    Nc, F = cand_feats.shape[1], cand_feats.shape[2]
    No = obj_feats.shape[1]

    # drop_env: eval-mode Dropout == identity.
    # TODO(synk): training-mode feature dropout (p=args.featdropout) not implemented.

    # Free (contiguous) reshapes — no concatenations, no extra HBM copies.
    cand_flat = cand_feats.reshape(Bq * Nc, F)
    obj_flat = obj_feats.reshape(Bq * No, F)
    objpos_flat = obj_pos.reshape(Bq * No, obj_pos.shape[-1])
    vmask = vis_mask.astype(jnp.float32)
    omask = obj_mask.astype(jnp.float32)

    inputs = (
        params["vecH"], params["ope_b"],
        params["w_asp_s"], params["w_asp_a"], params["w_img"], params["w_ope"],
        params["w_obj_v"], params["w_obj_p"], params["w_obj_a"],
        params["w_sp_h"], params["w_sp_v"],
        sentence, action_feats, cand_flat, obj_flat, objpos_flat,
        vmask, omask,
    )

    kernel = functools.partial(_vlnbert_visual_kernel, eps=LN_EPS)

    state_proj, logit, logit_obj = pl.pallas_call(
        kernel,
        out_shape=(
            jax.ShapeDtypeStruct((Bq, H), jnp.float32),
            jax.ShapeDtypeStruct((Bq, Nc), jnp.float32),
            jax.ShapeDtypeStruct((Bq, No), jnp.float32),
        ),
        grid_spec=pltpu.PrefetchScalarGridSpec(
            num_scalar_prefetch=0,
            grid=(1,),
            in_specs=[_full_spec(x.shape) for x in inputs],
            out_specs=(
                _full_spec((Bq, H)),
                _full_spec((Bq, Nc)),
                _full_spec((Bq, No)),
            ),
        ),
        compiler_params=pltpu.CompilerParams(dimension_semantics=("arbitrary",)),
    )(*inputs)
    return state_proj, logit, logit_obj


# ------------------------------ parameter init --------------------------------
def init_params(key):
    ks = jax.random.split(key, 9)
    std = 0.02
    H, A, V = HIDDEN, ANGLE, VIS

    def w(k, shape):
        return jax.random.normal(k, shape, jnp.float32) * std

    # Stacked biases / LayerNorm gammas & betas: one (12, H) block, one DMA.
    vecH = jnp.zeros((12, H), jnp.float32).at[
        jnp.array([_ALN_G, _CLN_G, _OLN_G, _SLN_G])].set(1.0)

    return {
        "vecH": vecH,
        "ope_b": jnp.zeros((1, A), jnp.float32),
        # action_state_project weight, split: [sentence[:,0] part ; action part]
        "w_asp_s": w(ks[0], (H, H)),
        "w_asp_a": w(ks[1], (A, H)),
        # img_projection
        "w_img": w(ks[2], (FEATURE, H)),
        # obj_pos_encode
        "w_ope": w(ks[3], (5, A)),
        # obj_projection weight, split: [visual ; pos_enc ; angle] row blocks
        "w_obj_v": w(ks[4], (V, H)),
        "w_obj_p": w(ks[5], (A, H)),
        "w_obj_a": w(ks[6], (A, H)),
        # state_proj weight, split: [h_t part ; attended_visual part]
        "w_sp_h": w(ks[7], (H, H)),
        "w_sp_v": w(ks[8], (H, H)),
    }


# ------------------------------------ main ------------------------------------
if __name__ == "__main__":
    key = jax.random.PRNGKey(0)
    kp, k1, k2, k3, k4, k5 = jax.random.split(key, 6)

    params = init_params(kp)

    sentence = jax.random.normal(k1, (B, L, HIDDEN), jnp.float32)
    action_feats = jax.random.normal(k2, (B, ANGLE), jnp.float32)
    cand_feats = jax.random.normal(k3, (B, N_CAND, FEATURE), jnp.float32)
    obj_feats = jax.random.normal(k4, (B, N_OBJ, FEATURE), jnp.float32)
    obj_pos = jax.random.uniform(k5, (B, N_OBJ, 5), jnp.float32)
    vis_mask = jnp.ones((B, N_CAND), jnp.float32)
    obj_mask = jnp.ones((B, N_OBJ), jnp.float32)

    fwd = jax.jit(vlnbert_visual_forward)
    state_proj, logit, logit_obj = fwd(
        params, sentence, action_feats, cand_feats, obj_feats, obj_pos, vis_mask, obj_mask)

    jax.block_until_ready((state_proj, logit, logit_obj))

    assert state_proj.shape == (B, HIDDEN)
    assert logit.shape == (B, N_CAND)
    assert logit_obj.shape == (B, N_OBJ)
    assert bool(jnp.isfinite(state_proj).all())
    assert bool(jnp.isfinite(logit).all())
    assert bool(jnp.isfinite(logit_obj).all())

    print("KERNEL_OK")
</pallas_src>

<mosaic_0001>
module attributes {stable_mosaic.version = 11 : i64} {
  func.func @_vlnbert_visual_kernel(%arg0: i32, %arg1: memref<12x128xf32, #tpu.memory_space<vmem>>, %arg2: memref<1x64xf32, #tpu.memory_space<vmem>>, %arg3: memref<128x128xf32, #tpu.memory_space<vmem>>, %arg4: memref<64x128xf32, #tpu.memory_space<vmem>>, %arg5: memref<320x128xf32, #tpu.memory_space<vmem>>, %arg6: memref<5x64xf32, #tpu.memory_space<vmem>>, %arg7: memref<256x128xf32, #tpu.memory_space<vmem>>, %arg8: memref<64x128xf32, #tpu.memory_space<vmem>>, %arg9: memref<64x128xf32, #tpu.memory_space<vmem>>, %arg10: memref<128x128xf32, #tpu.memory_space<vmem>>, %arg11: memref<128x128xf32, #tpu.memory_space<vmem>>, %arg12: memref<2x8x128xf32, #tpu.memory_space<vmem>>, %arg13: memref<2x64xf32, #tpu.memory_space<vmem>>, %arg14: memref<16x320xf32, #tpu.memory_space<vmem>>, %arg15: memref<16x320xf32, #tpu.memory_space<vmem>>, %arg16: memref<16x5xf32, #tpu.memory_space<vmem>>, %arg17: memref<2x8xf32, #tpu.memory_space<vmem>>, %arg18: memref<2x8xf32, #tpu.memory_space<vmem>>, %arg19: memref<2x128xf32, #tpu.memory_space<vmem>>, %arg20: memref<2x8xf32, #tpu.memory_space<vmem>>, %arg21: memref<2x8xf32, #tpu.memory_space<vmem>>) attributes {dimension_semantics = [#tpu.dimension_semantics<arbitrary>], iteration_bounds = array<i64: 1>, scalar_prefetch = 0 : i64, scratch_operands = 0 : i64, tpu.core_type = #tpu.core_type<tc>, window_params = [{pipeline_mode = #tpu.pipeline_mode<synchronous>, transform_indices = @transform_0, window_bounds = array<i64: 12, 128>}, {pipeline_mode = #tpu.pipeline_mode<synchronous>, transform_indices = @transform_1, window_bounds = array<i64: 1, 64>}, {pipeline_mode = #tpu.pipeline_mode<synchronous>, transform_indices = @transform_2, window_bounds = array<i64: 128, 128>}, {pipeline_mode = #tpu.pipeline_mode<synchronous>, transform_indices = @transform_3, window_bounds = array<i64: 64, 128>}, {pipeline_mode = #tpu.pipeline_mode<synchronous>, transform_indices = @transform_4, window_bounds = array<i64: 320, 128>}, {pipeline_mode = #tpu.pipeline_mode<synchronous>, transform_indices = @transform_5, window_bounds = array<i64: 5, 64>}, {pipeline_mode = #tpu.pipeline_mode<synchronous>, transform_indices = @transform_6, window_bounds = array<i64: 256, 128>}, {pipeline_mode = #tpu.pipeline_mode<synchronous>, transform_indices = @transform_7, window_bounds = array<i64: 64, 128>}, {pipeline_mode = #tpu.pipeline_mode<synchronous>, transform_indices = @transform_8, window_bounds = array<i64: 64, 128>}, {pipeline_mode = #tpu.pipeline_mode<synchronous>, transform_indices = @transform_9, window_bounds = array<i64: 128, 128>}, {pipeline_mode = #tpu.pipeline_mode<synchronous>, transform_indices = @transform_10, window_bounds = array<i64: 128, 128>}, {pipeline_mode = #tpu.pipeline_mode<synchronous>, transform_indices = @transform_11, window_bounds = array<i64: 2, 8, 128>}, {pipeline_mode = #tpu.pipeline_mode<synchronous>, transform_indices = @transform_12, window_bounds = array<i64: 2, 64>}, {pipeline_mode = #tpu.pipeline_mode<synchronous>, transform_indices = @transform_13, window_bounds = array<i64: 16, 320>}, {pipeline_mode = #tpu.pipeline_mode<synchronous>, transform_indices = @transform_14, window_bounds = array<i64: 16, 320>}, {pipeline_mode = #tpu.pipeline_mode<synchronous>, transform_indices = @transform_15, window_bounds = array<i64: 16, 5>}, {pipeline_mode = #tpu.pipeline_mode<synchronous>, transform_indices = @transform_16, window_bounds = array<i64: 2, 8>}, {pipeline_mode = #tpu.pipeline_mode<synchronous>, transform_indices = @transform_17, window_bounds = array<i64: 2, 8>}, {pipeline_mode = #tpu.pipeline_mode<synchronous>, transform_indices = @transform_18, window_bounds = array<i64: 2, 128>}, {pipeline_mode = #tpu.pipeline_mode<synchronous>, transform_indices = @transform_19, window_bounds = array<i64: 2, 8>}, {pipeline_mode = #tpu.pipeline_mode<synchronous>, transform_indices = @transform_20, window_bounds = array<i64: 2, 8>}]} {
    %c0 = arith.constant 0 : index
    %c0_0 = arith.constant 0 : index
    %0 = vector.load %arg1[%c0, %c0_0] : memref<12x128xf32, #tpu.memory_space<vmem>>, vector<12x128xf32>
    %c0_1 = arith.constant 0 : index
    %c0_2 = arith.constant 0 : index
    %c0_3 = arith.constant 0 : index
    %1 = vector.load %arg12[%c0_1, %c0_2, %c0_3] : memref<2x8x128xf32, #tpu.memory_space<vmem>>, vector<2x8x128xf32>
    %2 = vector.extract_strided_slice %1 {offsets = [0, 0, 0], sizes = [2, 1, 128], strides = [1, 1, 1]} : vector<2x8x128xf32> to vector<2x1x128xf32>
    %3 = vector.shape_cast %2 : vector<2x1x128xf32> to vector<2x128xf32>
    %c0_4 = arith.constant 0 : index
    %c0_5 = arith.constant 0 : index
    %4 = vector.load %arg13[%c0_4, %c0_5] : memref<2x64xf32, #tpu.memory_space<vmem>>, vector<2x64xf32>
    %c0_6 = arith.constant 0 : index
    %c0_7 = arith.constant 0 : index
    %5 = vector.load %arg3[%c0_6, %c0_7] : memref<128x128xf32, #tpu.memory_space<vmem>>, vector<128x128xf32>
    %cst = arith.constant dense<0.000000e+00> : vector<2x128xf32>
    %6 = tpu.matmul %3, %5, %cst {dimension_numbers = #tpu.dot_dimension_numbers<[1], [0], [0], [1], [0, 0, 1, 1], [], []>} : vector<2x128xf32>, vector<128x128xf32>, vector<2x128xf32> -> vector<2x128xf32>
    %c0_8 = arith.constant 0 : index
    %c0_9 = arith.constant 0 : index
    %7 = vector.load %arg4[%c0_8, %c0_9] : memref<64x128xf32, #tpu.memory_space<vmem>>, vector<64x128xf32>
    %cst_10 = arith.constant dense<0.000000e+00> : vector<2x128xf32>
    %8 = tpu.matmul %4, %7, %cst_10 {dimension_numbers = #tpu.dot_dimension_numbers<[1], [0], [0], [1], [0, 0, 1, 1], [], []>} : vector<2x64xf32>, vector<64x128xf32>, vector<2x128xf32> -> vector<2x128xf32>
    %9 = arith.addf %6, %8 : vector<2x128xf32>
    %10 = vector.extract_strided_slice %0 {offsets = [0, 0], sizes = [1, 128], strides = [1, 1]} : vector<12x128xf32> to vector<1x128xf32>
    %11 = vector.broadcast %10 : vector<1x128xf32> to vector<2x128xf32>
    %12 = arith.addf %9, %11 : vector<2x128xf32>
    %13 = math.tanh %12 : vector<2x128xf32>
    %cst_11 = arith.constant dense<0.000000e+00> : vector<2xf32>
    %14 = vector.multi_reduction <add>, %13, %cst_11 [1] : vector<2x128xf32> to vector<2xf32>
    %15 = vector.shape_cast %14 : vector<2xf32> to vector<2x1xf32>
    %cst_12 = arith.constant 1.280000e+02 : f32
    %16 = vector.broadcast %cst_12 : f32 to vector<2x1xf32>
    %17 = arith.divf %15, %16 : vector<2x1xf32>
    %18 = vector.broadcast %17 : vector<2x1xf32> to vector<2x128xf32>
    %19 = arith.subf %13, %18 : vector<2x128xf32>
    %20 = arith.mulf %19, %19 : vector<2x128xf32>
    %cst_13 = arith.constant dense<0.000000e+00> : vector<2xf32>
    %21 = vector.multi_reduction <add>, %20, %cst_13 [1] : vector<2x128xf32> to vector<2xf32>
    %22 = vector.shape_cast %21 : vector<2xf32> to vector<2x1xf32>
    %cst_14 = arith.constant 1.280000e+02 : f32
    %23 = vector.broadcast %cst_14 : f32 to vector<2x1xf32>
    %24 = arith.divf %22, %23 : vector<2x1xf32>
    %25 = vector.extract_strided_slice %0 {offsets = [1, 0], sizes = [1, 128], strides = [1, 1]} : vector<12x128xf32> to vector<1x128xf32>
    %26 = vector.broadcast %17 : vector<2x1xf32> to vector<2x128xf32>
    %27 = arith.subf %13, %26 : vector<2x128xf32>
    %cst_15 = arith.constant 9.99999996E-13 : f32
    %28 = vector.broadcast %cst_15 : f32 to vector<2x1xf32>
    %29 = arith.addf %24, %28 : vector<2x1xf32>
    %30 = math.rsqrt %29 : vector<2x1xf32>
    %31 = vector.broadcast %30 : vector<2x1xf32> to vector<2x128xf32>
    %32 = arith.mulf %27, %31 : vector<2x128xf32>
    %33 = vector.broadcast %25 : vector<1x128xf32> to vector<2x128xf32>
    %34 = arith.mulf %33, %32 : vector<2x128xf32>
    %35 = vector.extract_strided_slice %0 {offsets = [2, 0], sizes = [1, 128], strides = [1, 1]} : vector<12x128xf32> to vector<1x128xf32>
    %36 = vector.broadcast %35 : vector<1x128xf32> to vector<2x128xf32>
    %37 = arith.addf %34, %36 : vector<2x128xf32>
    %c0_16 = arith.constant 0 : index
    %c0_17 = arith.constant 0 : index
    %38 = vector.load %arg14[%c0_16, %c0_17] : memref<16x320xf32, #tpu.memory_space<vmem>>, vector<16x320xf32>
    %c0_18 = arith.constant 0 : index
    %c0_19 = arith.constant 0 : index
    %39 = vector.load %arg5[%c0_18, %c0_19] : memref<320x128xf32, #tpu.memory_space<vmem>>, vector<320x128xf32>
    %cst_20 = arith.constant dense<0.000000e+00> : vector<16x128xf32>
    %40 = tpu.matmul %38, %39, %cst_20 {dimension_numbers = #tpu.dot_dimension_numbers<[1], [0], [0], [1], [0, 0, 1, 1], [], []>} : vector<16x320xf32>, vector<320x128xf32>, vector<16x128xf32> -> vector<16x128xf32>
    %41 = vector.extract_strided_slice %0 {offsets = [3, 0], sizes = [1, 128], strides = [1, 1]} : vector<12x128xf32> to vector<1x128xf32>
    %42 = vector.broadcast %41 : vector<1x128xf32> to vector<16x128xf32>
    %43 = arith.addf %40, %42 : vector<16x128xf32>
    %cst_21 = arith.constant dense<0.000000e+00> : vector<16xf32>
    %44 = vector.multi_reduction <add>, %43, %cst_21 [1] : vector<16x128xf32> to vector<16xf32>
    %45 = vector.shape_cast %44 : vector<16xf32> to vector<16x1xf32>
    %cst_22 = arith.constant 1.280000e+02 : f32
    %46 = vector.broadcast %cst_22 : f32 to vector<16x1xf32>
    %47 = arith.divf %45, %46 : vector<16x1xf32>
    %48 = vector.broadcast %47 : vector<16x1xf32> to vector<16x128xf32>
    %49 = arith.subf %43, %48 : vector<16x128xf32>
    %50 = arith.mulf %49, %49 : vector<16x128xf32>
    %cst_23 = arith.constant dense<0.000000e+00> : vector<16xf32>
    %51 = vector.multi_reduction <add>, %50, %cst_23 [1] : vector<16x128xf32> to vector<16xf32>
    %52 = vector.shape_cast %51 : vector<16xf32> to vector<16x1xf32>
    %cst_24 = arith.constant 1.280000e+02 : f32
    %53 = vector.broadcast %cst_24 : f32 to vector<16x1xf32>
    %54 = arith.divf %52, %53 : vector<16x1xf32>
    %55 = vector.extract_strided_slice %0 {offsets = [4, 0], sizes = [1, 128], strides = [1, 1]} : vector<12x128xf32> to vector<1x128xf32>
    %56 = vector.broadcast %47 : vector<16x1xf32> to vector<16x128xf32>
    %57 = arith.subf %43, %56 : vector<16x128xf32>
    %cst_25 = arith.constant 9.99999996E-13 : f32
    %58 = vector.broadcast %cst_25 : f32 to vector<16x1xf32>
    %59 = arith.addf %54, %58 : vector<16x1xf32>
    %60 = math.rsqrt %59 : vector<16x1xf32>
    %61 = vector.broadcast %60 : vector<16x1xf32> to vector<16x128xf32>
    %62 = arith.mulf %57, %61 : vector<16x128xf32>
    %63 = vector.broadcast %55 : vector<1x128xf32> to vector<16x128xf32>
    %64 = arith.mulf %63, %62 : vector<16x128xf32>
    %65 = vector.extract_strided_slice %0 {offsets = [5, 0], sizes = [1, 128], strides = [1, 1]} : vector<12x128xf32> to vector<1x128xf32>
    %66 = vector.broadcast %65 : vector<1x128xf32> to vector<16x128xf32>
    %67 = arith.addf %64, %66 : vector<16x128xf32>
    %c0_26 = arith.constant 0 : index
    %c0_27 = arith.constant 0 : index
    %68 = vector.load %arg16[%c0_26, %c0_27] : memref<16x5xf32, #tpu.memory_space<vmem>>, vector<16x5xf32>
    %c0_28 = arith.constant 0 : index
    %c0_29 = arith.constant 0 : index
    %69 = vector.load %arg6[%c0_28, %c0_29] : memref<5x64xf32, #tpu.memory_space<vmem>>, vector<5x64xf32>
    %cst_30 = arith.constant dense<0.000000e+00> : vector<16x64xf32>
    %70 = tpu.matmul %68, %69, %cst_30 {dimension_numbers = #tpu.dot_dimension_numbers<[1], [0], [0], [1], [0, 0, 1, 1], [], []>} : vector<16x5xf32>, vector<5x64xf32>, vector<16x64xf32> -> vector<16x64xf32>
    %c0_31 = arith.constant 0 : index
    %c0_32 = arith.constant 0 : index
    %71 = vector.load %arg2[%c0_31, %c0_32] : memref<1x64xf32, #tpu.memory_space<vmem>>, vector<1x64xf32>
    %72 = vector.broadcast %71 : vector<1x64xf32> to vector<16x64xf32>
    %73 = arith.addf %70, %72 : vector<16x64xf32>
    %c0_33 = arith.constant 0 : index
    %c0_34 = arith.constant 0 : index
    %74 = vector.load %arg15[%c0_33, %c0_34] : memref<16x320xf32, #tpu.memory_space<vmem>>, vector<16x320xf32>
    %75 = vector.extract_strided_slice %74 {offsets = [0, 0], sizes = [16, 256], strides = [1, 1]} : vector<16x320xf32> to vector<16x256xf32>
    %c0_35 = arith.constant 0 : index
    %c0_36 = arith.constant 0 : index
    %76 = vector.load %arg7[%c0_35, %c0_36] : memref<256x128xf32, #tpu.memory_space<vmem>>, vector<256x128xf32>
    %cst_37 = arith.constant dense<0.000000e+00> : vector<16x128xf32>
    %77 = tpu.matmul %75, %76, %cst_37 {dimension_numbers = #tpu.dot_dimension_numbers<[1], [0], [0], [1], [0, 0, 1, 1], [], []>} : vector<16x256xf32>, vector<256x128xf32>, vector<16x128xf32> -> vector<16x128xf32>
    %c0_38 = arith.constant 0 : index
    %c0_39 = arith.constant 0 : index
    %78 = vector.load %arg8[%c0_38, %c0_39] : memref<64x128xf32, #tpu.memory_space<vmem>>, vector<64x128xf32>
    %cst_40 = arith.constant dense<0.000000e+00> : vector<16x128xf32>
    %79 = tpu.matmul %73, %78, %cst_40 {dimension_numbers = #tpu.dot_dimension_numbers<[1], [0], [0], [1], [0, 0, 1, 1], [], []>} : vector<16x64xf32>, vector<64x128xf32>, vector<16x128xf32> -> vector<16x128xf32>
    %80 = arith.addf %77, %79 : vector<16x128xf32>
    %81 = vector.extract_strided_slice %74 {offsets = [0, 256], sizes = [16, 64], strides = [1, 1]} : vector<16x320xf32> to vector<16x64xf32>
    %c0_41 = arith.constant 0 : index
    %c0_42 = arith.constant 0 : index
    %82 = vector.load %arg9[%c0_41, %c0_42] : memref<64x128xf32, #tpu.memory_space<vmem>>, vector<64x128xf32>
    %cst_43 = arith.constant dense<0.000000e+00> : vector<16x128xf32>
    %83 = tpu.matmul %81, %82, %cst_43 {dimension_numbers = #tpu.dot_dimension_numbers<[1], [0], [0], [1], [0, 0, 1, 1], [], []>} : vector<16x64xf32>, vector<64x128xf32>, vector<16x128xf32> -> vector<16x128xf32>
    %84 = arith.addf %80, %83 : vector<16x128xf32>
    %85 = vector.extract_strided_slice %0 {offsets = [6, 0], sizes = [1, 128], strides = [1, 1]} : vector<12x128xf32> to vector<1x128xf32>
    %86 = vector.broadcast %85 : vector<1x128xf32> to vector<16x128xf32>
    %87 = arith.addf %84, %86 : vector<16x128xf32>
    %cst_44 = arith.constant dense<0.000000e+00> : vector<16xf32>
    %88 = vector.multi_reduction <add>, %87, %cst_44 [1] : vector<16x128xf32> to vector<16xf32>
    %89 = vector.shape_cast %88 : vector<16xf32> to vector<16x1xf32>
    %cst_45 = arith.constant 1.280000e+02 : f32
    %90 = vector.broadcast %cst_45 : f32 to vector<16x1xf32>
    %91 = arith.divf %89, %90 : vector<16x1xf32>
    %92 = vector.broadcast %91 : vector<16x1xf32> to vector<16x128xf32>
    %93 = arith.subf %87, %92 : vector<16x128xf32>
    %94 = arith.mulf %93, %93 : vector<16x128xf32>
    %cst_46 = arith.constant dense<0.000000e+00> : vector<16xf32>
    %95 = vector.multi_reduction <add>, %94, %cst_46 [1] : vector<16x128xf32> to vector<16xf32>
    %96 = vector.shape_cast %95 : vector<16xf32> to vector<16x1xf32>
    %cst_47 = arith.constant 1.280000e+02 : f32
    %97 = vector.broadcast %cst_47 : f32 to vector<16x1xf32>
    %98 = arith.divf %96, %97 : vector<16x1xf32>
    %99 = vector.extract_strided_slice %0 {offsets = [7, 0], sizes = [1, 128], strides = [1, 1]} : vector<12x128xf32> to vector<1x128xf32>
    %100 = vector.broadcast %91 : vector<16x1xf32> to vector<16x128xf32>
    %101 = arith.subf %87, %100 : vector<16x128xf32>
    %cst_48 = arith.constant 9.99999996E-13 : f32
    %102 = vector.broadcast %cst_48 : f32 to vector<16x1xf32>
    %103 = arith.addf %98, %102 : vector<16x1xf32>
    %104 = math.rsqrt %103 : vector<16x1xf32>
    %105 = vector.broadcast %104 : vector<16x1xf32> to vector<16x128xf32>
    %106 = arith.mulf %101, %105 : vector<16x128xf32>
    %107 = vector.broadcast %99 : vector<1x128xf32> to vector<16x128xf32>
    %108 = arith.mulf %107, %106 : vector<16x128xf32>
    %109 = vector.extract_strided_slice %0 {offsets = [8, 0], sizes = [1, 128], strides = [1, 1]} : vector<12x128xf32> to vector<1x128xf32>
    %110 = vector.broadcast %109 : vector<1x128xf32> to vector<16x128xf32>
    %111 = arith.addf %108, %110 : vector<16x128xf32>
    %112 = vector.shape_cast %67 : vector<16x128xf32> to vector<2x8x128xf32>
    %113 = vector.shape_cast %111 : vector<16x128xf32> to vector<2x8x128xf32>
    %114 = vector.shape_cast %37 : vector<2x128xf32> to vector<2x1x128xf32>
    "tpu.trace_start"() <{level = 10 : i32, message = "bqh,bnh->bqn"}> : () -> ()
    %cst_49 = arith.constant dense<0.000000e+00> : vector<2x1x8xf32>
    %115 = tpu.matmul %114, %112, %cst_49 {dimension_numbers = #tpu.dot_dimension_numbers<[2], [2], [1], [1], [0, 0, 0, 1, 1, 1], [0], [0]>} : vector<2x1x128xf32>, vector<2x8x128xf32>, vector<2x1x8xf32> -> vector<2x1x8xf32>
    "tpu.trace_stop"() : () -> ()
    %116 = vector.shape_cast %115 : vector<2x1x8xf32> to vector<2x8xf32>
    %cst_50 = arith.constant 0.0883883461 : f32
    %117 = vector.broadcast %cst_50 : f32 to vector<2x8xf32>
    %118 = arith.mulf %116, %117 : vector<2x8xf32>
    "tpu.trace_start"() <{level = 10 : i32, message = "bqh,bnh->bqn"}> : () -> ()
    %cst_51 = arith.constant dense<0.000000e+00> : vector<2x1x8xf32>
    %119 = tpu.matmul %114, %113, %cst_51 {dimension_numbers = #tpu.dot_dimension_numbers<[2], [2], [1], [1], [0, 0, 0, 1, 1, 1], [0], [0]>} : vector<2x1x128xf32>, vector<2x8x128xf32>, vector<2x1x8xf32> -> vector<2x1x8xf32>
    "tpu.trace_stop"() : () -> ()
    %120 = vector.shape_cast %119 : vector<2x1x8xf32> to vector<2x8xf32>
    %cst_52 = arith.constant 0.0883883461 : f32
    %121 = vector.broadcast %cst_52 : f32 to vector<2x8xf32>
    %122 = arith.mulf %120, %121 : vector<2x8xf32>
    %c0_53 = arith.constant 0 : index
    %c0_54 = arith.constant 0 : index
    %123 = vector.load %arg17[%c0_53, %c0_54] : memref<2x8xf32, #tpu.memory_space<vmem>>, vector<2x8xf32>
    %cst_55 = arith.constant 5.000000e-01 : f32
    %124 = vector.broadcast %cst_55 : f32 to vector<2x8xf32>
    %125 = arith.cmpf ogt, %123, %124 : vector<2x8xf32>
    %cst_56 = arith.constant -1.000000e+09 : f32
    %126 = vector.broadcast %cst_56 : f32 to vector<2x8xf32>
    %127 = arith.select %125, %118, %126 : vector<2x8xi1>, vector<2x8xf32>
    %c0_57 = arith.constant 0 : index
    %c0_58 = arith.constant 0 : index
    %128 = vector.load %arg18[%c0_57, %c0_58] : memref<2x8xf32, #tpu.memory_space<vmem>>, vector<2x8xf32>
    %cst_59 = arith.constant 5.000000e-01 : f32
    %129 = vector.broadcast %cst_59 : f32 to vector<2x8xf32>
    %130 = arith.cmpf ogt, %128, %129 : vector<2x8xf32>
    %cst_60 = arith.constant -1.000000e+09 : f32
    %131 = vector.broadcast %cst_60 : f32 to vector<2x8xf32>
    %132 = arith.select %130, %122, %131 : vector<2x8xi1>, vector<2x8xf32>
    %cst_61 = arith.constant dense<0xFF800000> : vector<2xf32>
    %133 = vector.multi_reduction <maximumf>, %127, %cst_61 [1] : vector<2x8xf32> to vector<2xf32>
    %134 = vector.shape_cast %133 : vector<2xf32> to vector<2x1xf32>
    %cst_62 = arith.constant dense<0xFF800000> : vector<2xf32>
    %135 = vector.multi_reduction <maximumf>, %132, %cst_62 [1] : vector<2x8xf32> to vector<2xf32>
    %136 = vector.shape_cast %135 : vector<2xf32> to vector<2x1xf32>
    %137 = arith.maximumf %134, %136 : vector<2x1xf32>
    %138 = vector.broadcast %137 : vector<2x1xf32> to vector<2x8xf32>
    %139 = arith.subf %127, %138 : vector<2x8xf32>
    %140 = math.exp %139 : vector<2x8xf32>
    %141 = vector.broadcast %137 : vector<2x1xf32> to vector<2x8xf32>
    %142 = arith.subf %132, %141 : vector<2x8xf32>
    %143 = math.exp %142 : vector<2x8xf32>
    %cst_63 = arith.constant dense<0.000000e+00> : vector<2xf32>
    %144 = vector.multi_reduction <add>, %140, %cst_63 [1] : vector<2x8xf32> to vector<2xf32>
    %145 = vector.shape_cast %144 : vector<2xf32> to vector<2x1xf32>
    %cst_64 = arith.constant dense<0.000000e+00> : vector<2xf32>
    %146 = vector.multi_reduction <add>, %143, %cst_64 [1] : vector<2x8xf32> to vector<2xf32>
    %147 = vector.shape_cast %146 : vector<2xf32> to vector<2x1xf32>
    %148 = arith.addf %145, %147 : vector<2x1xf32>
    %149 = tpu.reciprocal %148 {approx = true} : vector<2x1xf32> -> vector<2x1xf32>
    %150 = vector.broadcast %149 : vector<2x1xf32> to vector<2x8xf32>
    %151 = arith.mulf %140, %150 : vector<2x8xf32>
    %152 = vector.broadcast %149 : vector<2x1xf32> to vector<2x8xf32>
    %153 = arith.mulf %143, %152 : vector<2x8xf32>
    %154 = vector.shape_cast %151 : vector<2x8xf32> to vector<2x1x8xf32>
    "tpu.trace_start"() <{level = 10 : i32, message = "bqn,bnh->bqh"}> : () -> ()
    %cst_65 = arith.constant dense<0.000000e+00> : vector<2x1x128xf32>
    %155 = tpu.matmul %154, %112, %cst_65 {dimension_numbers = #tpu.dot_dimension_numbers<[2], [1], [1], [2], [0, 0, 0, 1, 1, 2], [0], [0]>} : vector<2x1x8xf32>, vector<2x8x128xf32>, vector<2x1x128xf32> -> vector<2x1x128xf32>
    "tpu.trace_stop"() : () -> ()
    %156 = vector.shape_cast %153 : vector<2x8xf32> to vector<2x1x8xf32>
    "tpu.trace_start"() <{level = 10 : i32, message = "bqn,bnh->bqh"}> : () -> ()
    %cst_66 = arith.constant dense<0.000000e+00> : vector<2x1x128xf32>
    %157 = tpu.matmul %156, %113, %cst_66 {dimension_numbers = #tpu.dot_dimension_numbers<[2], [1], [1], [2], [0, 0, 0, 1, 1, 2], [0], [0]>} : vector<2x1x8xf32>, vector<2x8x128xf32>, vector<2x1x128xf32> -> vector<2x1x128xf32>
    "tpu.trace_stop"() : () -> ()
    %158 = arith.addf %155, %157 : vector<2x1x128xf32>
    %159 = vector.shape_cast %158 : vector<2x1x128xf32> to vector<2x128xf32>
    %c0_67 = arith.constant 0 : index
    %c0_68 = arith.constant 0 : index
    %160 = vector.load %arg10[%c0_67, %c0_68] : memref<128x128xf32, #tpu.memory_space<vmem>>, vector<128x128xf32>
    %cst_69 = arith.constant dense<0.000000e+00> : vector<2x128xf32>
    %161 = tpu.matmul %37, %160, %cst_69 {dimension_numbers = #tpu.dot_dimension_numbers<[1], [0], [0], [1], [0, 0, 1, 1], [], []>} : vector<2x128xf32>, vector<128x128xf32>, vector<2x128xf32> -> vector<2x128xf32>
    %c0_70 = arith.constant 0 : index
    %c0_71 = arith.constant 0 : index
    %162 = vector.load %arg11[%c0_70, %c0_71] : memref<128x128xf32, #tpu.memory_space<vmem>>, vector<128x128xf32>
    %cst_72 = arith.constant dense<0.000000e+00> : vector<2x128xf32>
    %163 = tpu.matmul %159, %162, %cst_72 {dimension_numbers = #tpu.dot_dimension_numbers<[1], [0], [0], [1], [0, 0, 1, 1], [], []>} : vector<2x128xf32>, vector<128x128xf32>, vector<2x128xf32> -> vector<2x128xf32>
    %164 = arith.addf %161, %163 : vector<2x128xf32>
    %165 = vector.extract_strided_slice %0 {offsets = [9, 0], sizes = [1, 128], strides = [1, 1]} : vector<12x128xf32> to vector<1x128xf32>
    %166 = vector.broadcast %165 : vector<1x128xf32> to vector<2x128xf32>
    %167 = arith.addf %164, %166 : vector<2x128xf32>
    %cst_73 = arith.constant dense<0.000000e+00> : vector<2xf32>
    %168 = vector.multi_reduction <add>, %167, %cst_73 [1] : vector<2x128xf32> to vector<2xf32>
    %169 = vector.shape_cast %168 : vector<2xf32> to vector<2x1xf32>
    %cst_74 = arith.constant 1.280000e+02 : f32
    %170 = vector.broadcast %cst_74 : f32 to vector<2x1xf32>
    %171 = arith.divf %169, %170 : vector<2x1xf32>
    %172 = vector.broadcast %171 : vector<2x1xf32> to vector<2x128xf32>
    %173 = arith.subf %167, %172 : vector<2x128xf32>
    %174 = arith.mulf %173, %173 : vector<2x128xf32>
    %cst_75 = arith.constant dense<0.000000e+00> : vector<2xf32>
    %175 = vector.multi_reduction <add>, %174, %cst_75 [1] : vector<2x128xf32> to vector<2xf32>
    %176 = vector.shape_cast %175 : vector<2xf32> to vector<2x1xf32>
    %cst_76 = arith.constant 1.280000e+02 : f32
    %177 = vector.broadcast %cst_76 : f32 to vector<2x1xf32>
    %178 = arith.divf %176, %177 : vector<2x1xf32>
    %179 = vector.extract_strided_slice %0 {offsets = [10, 0], sizes = [1, 128], strides = [1, 1]} : vector<12x128xf32> to vector<1x128xf32>
    %180 = vector.broadcast %171 : vector<2x1xf32> to vector<2x128xf32>
    %181 = arith.subf %167, %180 : vector<2x128xf32>
    %cst_77 = arith.constant 9.99999996E-13 : f32
    %182 = vector.broadcast %cst_77 : f32 to vector<2x1xf32>
    %183 = arith.addf %178, %182 : vector<2x1xf32>
    %184 = math.rsqrt %183 : vector<2x1xf32>
    %185 = vector.broadcast %184 : vector<2x1xf32> to vector<2x128xf32>
    %186 = arith.mulf %181, %185 : vector<2x128xf32>
    %187 = vector.broadcast %179 : vector<1x128xf32> to vector<2x128xf32>
    %188 = arith.mulf %187, %186 : vector<2x128xf32>
    %189 = vector.extract_strided_slice %0 {offsets = [11, 0], sizes = [1, 128], strides = [1, 1]} : vector<12x128xf32> to vector<1x128xf32>
    %190 = vector.broadcast %189 : vector<1x128xf32> to vector<2x128xf32>
    %191 = arith.addf %188, %190 : vector<2x128xf32>
    %c0_78 = arith.constant 0 : index
    %c0_79 = arith.constant 0 : index
    %192 = vector.load %arg19[%c0_78, %c0_79] : memref<2x128xf32, #tpu.memory_space<vmem>>, vector<2x128xf32>
    tpu.vector_store %arg19[%c0_78, %c0_79], %191 {strides = array<i32>} : memref<2x128xf32, #tpu.memory_space<vmem>>, vector<2x128xf32>,
    %c0_80 = arith.constant 0 : index
    %c0_81 = arith.constant 0 : index
    %193 = vector.load %arg20[%c0_80, %c0_81] : memref<2x8xf32, #tpu.memory_space<vmem>>, vector<2x8xf32>
    tpu.vector_store %arg20[%c0_80, %c0_81], %127 {strides = array<i32>} : memref<2x8xf32, #tpu.memory_space<vmem>>, vector<2x8xf32>,
    %c0_82 = arith.constant 0 : index
    %c0_83 = arith.constant 0 : index
    %194 = vector.load %arg21[%c0_82, %c0_83] : memref<2x8xf32, #tpu.memory_space<vmem>>, vector<2x8xf32>
    tpu.vector_store %arg21[%c0_82, %c0_83], %132 {strides = array<i32>} : memref<2x8xf32, #tpu.memory_space<vmem>>, vector<2x8xf32>,
    return
  }
  func.func @transform_0(%arg0: i32) -> (i32, i32) {
    %c0_i32 = arith.constant 0 : i32
    %c0_i32_0 = arith.constant 0 : i32
    %c0_i32_1 = arith.constant 0 : i32
    return %c0_i32, %c0_i32_0 : i32, i32
  }
  func.func @transform_1(%arg0: i32) -> (i32, i32) {
    %c0_i32 = arith.constant 0 : i32
    %c0_i32_0 = arith.constant 0 : i32
    %c0_i32_1 = arith.constant 0 : i32
    return %c0_i32, %c0_i32_0 : i32, i32
  }
  func.func @transform_2(%arg0: i32) -> (i32, i32) {
    %c0_i32 = arith.constant 0 : i32
    %c0_i32_0 = arith.constant 0 : i32
    %c0_i32_1 = arith.constant 0 : i32
    return %c0_i32, %c0_i32_0 : i32, i32
  }
  func.func @transform_3(%arg0: i32) -> (i32, i32) {
    %c0_i32 = arith.constant 0 : i32
    %c0_i32_0 = arith.constant 0 : i32
    %c0_i32_1 = arith.constant 0 : i32
    return %c0_i32, %c0_i32_0 : i32, i32
  }
  func.func @transform_4(%arg0: i32) -> (i32, i32) {
    %c0_i32 = arith.constant 0 : i32
    %c0_i32_0 = arith.constant 0 : i32
    %c0_i32_1 = arith.constant 0 : i32
    return %c0_i32, %c0_i32_0 : i32, i32
  }
  func.func @transform_5(%arg0: i32) -> (i32, i32) {
    %c0_i32 = arith.constant 0 : i32
    %c0_i32_0 = arith.constant 0 : i32
    %c0_i32_1 = arith.constant 0 : i32
    return %c0_i32, %c0_i32_0 : i32, i32
  }
  func.func @transform_6(%arg0: i32) -> (i32, i32) {
    %c0_i32 = arith.constant 0 : i32
    %c0_i32_0 = arith.constant 0 : i32
    %c0_i32_1 = arith.constant 0 : i32
    return %c0_i32, %c0_i32_0 : i32, i32
  }
  func.func @transform_7(%arg0: i32) -> (i32, i32) {
    %c0_i32 = arith.constant 0 : i32
    %c0_i32_0 = arith.constant 0 : i32
    %c0_i32_1 = arith.constant 0 : i32
    return %c0_i32, %c0_i32_0 : i32, i32
  }
  func.func @transform_8(%arg0: i32) -> (i32, i32) {
    %c0_i32 = arith.constant 0 : i32
    %c0_i32_0 = arith.constant 0 : i32
    %c0_i32_1 = arith.constant 0 : i32
    return %c0_i32, %c0_i32_0 : i32, i32
  }
  func.func @transform_9(%arg0: i32) -> (i32, i32) {
    %c0_i32 = arith.constant 0 : i32
    %c0_i32_0 = arith.constant 0 : i32
    %c0_i32_1 = arith.constant 0 : i32
    return %c0_i32, %c0_i32_0 : i32, i32
  }
  func.func @transform_10(%arg0: i32) -> (i32, i32) {
    %c0_i32 = arith.constant 0 : i32
    %c0_i32_0 = arith.constant 0 : i32
    %c0_i32_1 = arith.constant 0 : i32
    return %c0_i32, %c0_i32_0 : i32, i32
  }
  func.func @transform_11(%arg0: i32) -> (i32, i32, i32) {
    %c0_i32 = arith.constant 0 : i32
    %c0_i32_0 = arith.constant 0 : i32
    %c0_i32_1 = arith.constant 0 : i32
    %c0_i32_2 = arith.constant 0 : i32
    return %c0_i32, %c0_i32_0, %c0_i32_1 : i32, i32, i32
  }
  func.func @transform_12(%arg0: i32) -> (i32, i32) {
    %c0_i32 = arith.constant 0 : i32
    %c0_i32_0 = arith.constant 0 : i32
    %c0_i32_1 = arith.constant 0 : i32
    return %c0_i32, %c0_i32_0 : i32, i32
  }
  func.func @transform_13(%arg0: i32) -> (i32, i32) {
    %c0_i32 = arith.constant 0 : i32
    %c0_i32_0 = arith.constant 0 : i32
    %c0_i32_1 = arith.constant 0 : i32
    return %c0_i32, %c0_i32_0 : i32, i32
  }
  func.func @transform_14(%arg0: i32) -> (i32, i32) {
    %c0_i32 = arith.constant 0 : i32
    %c0_i32_0 = arith.constant 0 : i32
    %c0_i32_1 = arith.constant 0 : i32
    return %c0_i32, %c0_i32_0 : i32, i32
  }
  func.func @transform_15(%arg0: i32) -> (i32, i32) {
    %c0_i32 = arith.constant 0 : i32
    %c0_i32_0 = arith.constant 0 : i32
    %c0_i32_1 = arith.constant 0 : i32
    return %c0_i32, %c0_i32_0 : i32, i32
  }
  func.func @transform_16(%arg0: i32) -> (i32, i32) {
    %c0_i32 = arith.constant 0 : i32
    %c0_i32_0 = arith.constant 0 : i32
    %c0_i32_1 = arith.constant 0 : i32
    return %c0_i32, %c0_i32_0 : i32, i32
  }
  func.func @transform_17(%arg0: i32) -> (i32, i32) {
    %c0_i32 = arith.constant 0 : i32
    %c0_i32_0 = arith.constant 0 : i32
    %c0_i32_1 = arith.constant 0 : i32
    return %c0_i32, %c0_i32_0 : i32, i32
  }
  func.func @transform_18(%arg0: i32) -> (i32, i32) {
    %c0_i32 = arith.constant 0 : i32
    %c0_i32_0 = arith.constant 0 : i32
    %c0_i32_1 = arith.constant 0 : i32
    return %c0_i32, %c0_i32_0 : i32, i32
  }
  func.func @transform_19(%arg0: i32) -> (i32, i32) {
    %c0_i32 = arith.constant 0 : i32
    %c0_i32_0 = arith.constant 0 : i32
    %c0_i32_1 = arith.constant 0 : i32
    return %c0_i32, %c0_i32_0 : i32, i32
  }
  func.func @transform_20(%arg0: i32) -> (i32, i32) {
    %c0_i32 = arith.constant 0 : i32
    %c0_i32_0 = arith.constant 0 : i32
    %c0_i32_1 = arith.constant 0 : i32
    return %c0_i32, %c0_i32_0 : i32, i32
  }
}

</mosaic_0001>

<bundles_post_ra>
// kernel: vlnbert_visual_forward.1
= control target key start
LH: loop header
LB: loop body
LE: loop exit
PB: predicated region body
PF: predicated region fallthrough
CT: control target
= control target key end

     0   :  { %s3600_s0 = inlined_call_operand.vmem [shape: f32[12,128], index: 0, kind: input, shape index: {}]   ;;  %s3601_s1 = inlined_call_operand.hbm [shape: f32[1,64], index: 1, kind: input, shape index: {}]   ;;  %s3602_s2 = inlined_call_operand.hbm [shape: f32[128,128], index: 2, kind: input, shape index: {}]   ;;  %s3603_s3 = inlined_call_operand.hbm [shape: f32[64,128], index: 3, kind: input, shape index: {}]   ;;  %s3604_s4 = inlined_call_operand.hbm [shape: f32[320,128], index: 4, kind: input, shape index: {}]   ;;  %s3605_s5 = inlined_call_operand.hbm [shape: f32[5,64], index: 5, kind: input, shape index: {}]   ;;  %s3606_s6 = inlined_call_operand.hbm [shape: f32[256,128], index: 6, kind: input, shape index: {}]   ;;  %s3607_s7 = inlined_call_operand.hbm [shape: f32[64,128], index: 7, kind: input, shape index: {}]   ;;  %s3608_s8 = inlined_call_operand.hbm [shape: f32[64,128], index: 8, kind: input, shape index: {}]   ;;  %s3609_s9 = inlined_call_operand.hbm [shape: f32[128,128], index: 9, kind: input, shape index: {}]   ;;  %s3610_s10 = inlined_call_operand.hbm [shape: f32[128,128], index: 10, kind: input, shape index: {}]   ;;  %s3611_s11 = inlined_call_operand.vmem [shape: f32[2,8,128], index: 11, kind: input, shape index: {}]   ;;  %s3612_s12 = inlined_call_operand.hbm [shape: f32[2,64], index: 12, kind: input, shape index: {}]   ;;  %s3613_s13 = inlined_call_operand.vmem [shape: f32[16,320], index: 13, kind: input, shape index: {}]   ;;  %s3614_s14 = inlined_call_operand.hbm [shape: f32[16,320], index: 14, kind: input, shape index: {}]   ;;  %s3615_s15 = inlined_call_operand.vmem [shape: f32[16,5], index: 15, kind: input, shape index: {}]   ;;  %s3616_s16 = inlined_call_operand.vmem [shape: f32[2,8], index: 16, kind: input, shape index: {}]   ;;  %s3617_s17 = inlined_call_operand.vmem [shape: f32[2,8], index: 17, kind: input, shape index: {}]   ;;  %s3618_s18 = inlined_call_operand.hbm [shape: f32[2,128], index: 18, kind: output, shape index: {0}]   ;;  %s3619_s19 = inlined_call_operand.hbm [shape: f32[2,8], index: 19, kind: output, shape index: {1}]   ;;  %s3620_s20 = inlined_call_operand.hbm [shape: f32[2,8], index: 20, kind: output, shape index: {2}]  }
   0x1   :  { %3629 = sst [smem:[#allocation35_spill]] %s3600_s0 }
   0x2   :  { %3630 = sst [smem:[#allocation36_spill]] %s3601_s1 }
   0x3   :  { %3631 = sst [smem:[#allocation37_spill]] %s3602_s2 }
   0x4   :  { %3632 = sst [smem:[#allocation38_spill]] %s3603_s3 }
   0x5   :  { %3633 = sst [smem:[#allocation39_spill]] %s3604_s4 }
   0x6   :  { %3634 = sst [smem:[#allocation40_spill]] %s3618_s18 }
   0x7   :  { %3635 = sst [smem:[#allocation41_spill]] %s3619_s19 }
   0x8   :  { %3636 = sst [smem:[#allocation42_spill]] %s3620_s20 }
   0x9   :  { %26 = vsyncpa [#allocation3], 0 }
   0xa   :  { %27 = vsyncpa [#allocation6], 0 }
   0xb   :  { %28 = vsyncpa [#allocation9], 0 }
   0xc   :  { %29 = vsyncpa [#allocation12], 0 }
   0xd   :  { %30 = vsyncpa [#allocation15], 0 }
   0xe   :  { %31 = vsyncpa [#allocation18], 0 }
   0xf   :  { %32 = vsyncpa [#allocation21], 0 }
  0x10   :  { %33 = vsyncpa [#allocation4], 0 }
  0x11   :  { %34 = vsyncpa [#allocation24], 0  ;;  %s3061_s1 = smov [#allocation5]   ;;  %s3637_s2 = sld [smem:[#allocation37_spill]] }
  0x12   :  { %s52_s22 = sshll.u32 %s3061_s1, 4  ;;  %s53_s22 = int_to_ptr.vmem [resolvable:$true] %s52_s22 }
  0x17   :  { %s2713_s25 = scalar_lea.hbm %s3637_s2, 2048 }
  0x18   :  { %p2714_p0 = scmp.ne.s32.totalorder %s3637_s2, %s2713_s25  ;;  %p2717_p1 = scmp.lt.u32.totalorder %s2713_s25, %s3637_s2 }
  0x1a   :  { %p2719_p2 = pnand %p2717_p1, %p2714_p0 }
  0x1c   :  { %2722 = shalt.err (!%p2719_p2)
}
  0x1d   :  { %s2723_s4 = scalar_lea.vmem %s53_s22, 2048  ;;  %p2728_p4 = scmp.lt.s32.totalorder %s53_s22, %s53_s22 }
  0x1e   :  { %p2724_p3 = scmp.ne.s32.totalorder %s53_s22, %s2723_s4  ;;  %p2729_p5 = scmp.lt.s32.totalorder %s2723_s4, %s2723_s4 }
  0x20   :  { %p2730_p6 = por %p2729_p5, %p2728_p4 }
  0x22   :  { %p2731_p7 = pnand %p2730_p6, %p2724_p3 }
  0x24   :  { %2734 = shalt.err (!%p2731_p7)
}
  0x25   :  { %s3062_s29 = smov 128   ;;  %s3063_s30 = smov 8  }
  0x26   :  { %58 = dma.hbm_to_vmem [thread:$0]  %s3637_s2, 2048, %s53_s22, [#allocation6], %s3062_s29, %s3062_s29, %s3063_s30  }
  0x27   :  { %s3064_s1 = smov [#allocation8]   ;;  %s3065_s24 = smov [#allocation11]  }
  0x28   :  { %s76_s23 = sshll.u32 %s3064_s1, 4  ;;  %s98_s25 = sshll.u32 %s3065_s24, 4  ;;  %s77_s23 = int_to_ptr.vmem [resolvable:$true] %s76_s23  ;;  %s99_s25 = int_to_ptr.vmem [resolvable:$true] %s98_s25 }
  0x29   :  { %s3638_s27 = sld [smem:[#allocation39_spill]] }
  0x2f   :  { %s2735_s28 = scalar_lea.hbm %s3638_s27, 5120 }
  0x30   :  { %p2736_p8 = scmp.ne.s32.totalorder %s3638_s27, %s2735_s28  ;;  %p2739_p9 = scmp.lt.u32.totalorder %s2735_s28, %s3638_s27 }
  0x32   :  { %p2741_p10 = pnand %p2739_p9, %p2736_p8 }
  0x34   :  { %2744 = shalt.err (!%p2741_p10)
}
  0x35   :  { %s2745_s22 = scalar_lea.vmem %s77_s23, 5120  ;;  %p2750_p12 = scmp.lt.s32.totalorder %s77_s23, %s77_s23 }
  0x36   :  { %p2746_p11 = scmp.ne.s32.totalorder %s77_s23, %s2745_s22  ;;  %p2751_p13 = scmp.lt.s32.totalorder %s2745_s22, %s2745_s22 }
  0x38   :  { %p2752_p0 = por %p2751_p13, %p2750_p12 }
  0x3a   :  { %p2753_p1 = pnand %p2752_p0, %p2746_p11 }
  0x3c   :  { %2756 = shalt.err (!%p2753_p1)
}
  0x3d   :  { %82 = dma.hbm_to_vmem [thread:$0]  %s3638_s27, 5120, %s77_s23, [#allocation9], %s3062_s29, %s3062_s29, %s3063_s30  }
  0x3e   :  { %s2757_s20 = scalar_lea.hbm %s3606_s6, 4096 }
  0x3f   :  { %p2758_p2 = scmp.ne.s32.totalorder %s3606_s6, %s2757_s20  ;;  %p2761_p3 = scmp.lt.u32.totalorder %s2757_s20, %s3606_s6 }
  0x41   :  { %p2763_p4 = pnand %p2761_p3, %p2758_p2 }
  0x43   :  { %2766 = shalt.err (!%p2763_p4)
}
  0x44   :  { %s2767_s26 = scalar_lea.vmem %s99_s25, 4096  ;;  %p2772_p6 = scmp.lt.s32.totalorder %s99_s25, %s99_s25 }
  0x45   :  { %p2768_p5 = scmp.ne.s32.totalorder %s99_s25, %s2767_s26  ;;  %p2773_p7 = scmp.lt.s32.totalorder %s2767_s26, %s2767_s26 }
  0x47   :  { %p2774_p8 = por %p2773_p7, %p2772_p6 }
  0x49   :  { %p2775_p9 = pnand %p2774_p8, %p2768_p5 }
  0x4b   :  { %2778 = shalt.err (!%p2775_p9)
}
  0x4c   :  { %104 = dma.hbm_to_vmem [thread:$0]  %s3606_s6, 4096, %s99_s25, [#allocation12], %s3062_s29, %s3062_s29, %s3063_s30  }
  0x4d   :  { %s3066_s28 = smov [#allocation14]   ;;  %s3067_s22 = smov [#allocation17]  }
  0x4e   :  { %s122_s4 = sshll.u32 %s3066_s28, 4  ;;  %s146_s2 = sshll.u32 %s3067_s22, 4  ;;  %s123_s4 = int_to_ptr.vmem [resolvable:$true] %s122_s4  ;;  %s147_s2 = int_to_ptr.vmem [resolvable:$true] %s146_s2 }
  0x4f   :  { %s2779_s19 = scalar_lea.hbm %s3608_s8, 1024 }
  0x50   :  { %p2780_p10 = scmp.ne.s32.totalorder %s3608_s8, %s2779_s19  ;;  %p2783_p11 = scmp.lt.u32.totalorder %s2779_s19, %s3608_s8 }
  0x52   :  { %p2785_p12 = pnand %p2783_p11, %p2780_p10 }
  0x54   :  { %2788 = shalt.err (!%p2785_p12)
}
  0x55   :  { %s2789_s6 = scalar_lea.vmem %s123_s4, 1024  ;;  %p2794_p0 = scmp.lt.s32.totalorder %s123_s4, %s123_s4 }
  0x56   :  { %p2790_p13 = scmp.ne.s32.totalorder %s123_s4, %s2789_s6  ;;  %p2795_p1 = scmp.lt.s32.totalorder %s2789_s6, %s2789_s6 }
  0x58   :  { %p2796_p2 = por %p2795_p1, %p2794_p0 }
  0x5a   :  { %p2797_p3 = pnand %p2796_p2, %p2790_p13 }
  0x5c   :  { %2800 = shalt.err (!%p2797_p3)
}
  0x5d   :  { %128 = dma.hbm_to_vmem [thread:$0]  %s3608_s8, 1024, %s123_s4, [#allocation15], %s3062_s29, %s3062_s29, %s3063_s30  }
  0x5e   :  { %s2801_s27 = scalar_lea.hbm %s3610_s10, 2048 }
  0x5f   :  { %p2802_p4 = scmp.ne.s32.totalorder %s3610_s10, %s2801_s27  ;;  %p2805_p5 = scmp.lt.u32.totalorder %s2801_s27, %s3610_s10 }
  0x61   :  { %p2807_p6 = pnand %p2805_p5, %p2802_p4 }
  0x63   :  { %2810 = shalt.err (!%p2807_p6)
}
  0x64   :  { %s2811_s19 = scalar_lea.vmem %s147_s2, 2048  ;;  %p2816_p8 = scmp.lt.s32.totalorder %s147_s2, %s147_s2 }
  0x65   :  { %p2812_p7 = scmp.ne.s32.totalorder %s147_s2, %s2811_s19  ;;  %p2817_p9 = scmp.lt.s32.totalorder %s2811_s19, %s2811_s19 }
  0x67   :  { %p2818_p10 = por %p2817_p9, %p2816_p8 }
  0x69   :  { %p2819_p11 = pnand %p2818_p10, %p2812_p7 }
  0x6b   :  { %2822 = shalt.err (!%p2819_p11)
}
  0x6c   :  { %152 = dma.hbm_to_vmem [thread:$0]  %s3610_s10, 2048, %s147_s2, [#allocation18], %s3062_s29, %s3062_s29, %s3063_s30  }
  0x6d   :  { %s3068_s20 = smov [#allocation2]   ;;  %s3069_s1 = smov [#allocation7]  }
  0x6e   :  { %s43_s21 = sshll.u32 %s3068_s20, 4  ;;  %s64_s24 = sshll.u32 %s3069_s1, 4  ;;  %s44_s21 = int_to_ptr.vmem [resolvable:$true] %s43_s21  ;;  %s65_s24 = int_to_ptr.vmem [resolvable:$true] %s64_s24 }
  0x6f   :  { %s3639_s3 = sld [smem:[#allocation36_spill]] }
  0x75   :  { %s2823_s26 = scalar_lea.hbm %s3639_s3, 16 }
  0x76   :  { %p2824_p12 = scmp.ne.s32.totalorder %s3639_s3, %s2823_s26  ;;  %p2827_p13 = scmp.lt.u32.totalorder %s2823_s26, %s3639_s3 }
  0x78   :  { %p2829_p0 = pnand %p2827_p13, %p2824_p12 }
  0x7a   :  { %2832 = shalt.err (!%p2829_p0)
}
  0x7b   :  { %s2833_s10 = scalar_lea.vmem %s44_s21, 16  ;;  %s2837_s2 = scalar_lea.vmem %s44_s21, 32 }
  0x7c   :  { %p2834_p1 = scmp.ne.s32.totalorder %s44_s21, %s2833_s10  ;;  %p2838_p2 = scmp.lt.s32.totalorder %s44_s21, %s44_s21 }
  0x7d   :  { %p2839_p3 = scmp.lt.s32.totalorder %s2837_s2, %s2833_s10 }
  0x7f   :  { %p2840_p4 = por %p2839_p3, %p2838_p2 }
  0x81   :  { %p2841_p5 = pnand %p2840_p4, %p2834_p1 }
  0x83   :  { %2844 = shalt.err (!%p2841_p5)
}
  0x84   :  { %46 = dma.hbm_to_vmem [thread:$0]  %s3639_s3, 16, %s44_s21, [#allocation3]  }
  0x85   :  { %s3640_s4 = sld [smem:[#allocation38_spill]] }
  0x8b   :  { %s2845_s20 = scalar_lea.hbm %s3640_s4, 1024 }
  0x8c   :  { %p2846_p6 = scmp.ne.s32.totalorder %s3640_s4, %s2845_s20  ;;  %p2849_p7 = scmp.lt.u32.totalorder %s2845_s20, %s3640_s4 }
  0x8e   :  { %p2851_p8 = pnand %p2849_p7, %p2846_p6 }
  0x90   :  { %2854 = shalt.err (!%p2851_p8)
}
  0x91   :  { %s2855_s23 = scalar_lea.vmem %s65_s24, 1024  ;;  %p2860_p10 = scmp.lt.s32.totalorder %s65_s24, %s65_s24 }
  0x92   :  { %p2856_p9 = scmp.ne.s32.totalorder %s65_s24, %s2855_s23  ;;  %p2861_p11 = scmp.lt.s32.totalorder %s2855_s23, %s2855_s23 }
  0x94   :  { %p2862_p12 = por %p2861_p11, %p2860_p10 }
  0x96   :  { %p2863_p13 = pnand %p2862_p12, %p2856_p9 }
  0x98   :  { %2866 = shalt.err (!%p2863_p13)
}
  0x99   :  { %70 = dma.hbm_to_vmem [thread:$0]  %s3640_s4, 1024, %s65_s24, [#allocation6], %s3062_s29, %s3062_s29, %s3063_s30  }
  0x9a   :  { %s3070_s27 = smov [#allocation10]   ;;  %s3071_s22 = smov [#allocation13]  }
  0x9b   :  { %s89_s28 = sshll.u32 %s3070_s27, 4  ;;  %s110_s10 = sshll.u32 %s3071_s22, 4  ;;  %s90_s28 = int_to_ptr.vmem [resolvable:$true] %s89_s28  ;;  %s111_s10 = int_to_ptr.vmem [resolvable:$true] %s110_s10 }
  0x9c   :  { %s2867_s18 = scalar_lea.hbm %s3605_s5, 128 }
  0x9d   :  { %p2868_p0 = scmp.ne.s32.totalorder %s3605_s5, %s2867_s18  ;;  %p2871_p1 = scmp.lt.u32.totalorder %s2867_s18, %s3605_s5 }
  0x9f   :  { %p2873_p2 = pnand %p2871_p1, %p2868_p0 }
  0xa1   :  { %2876 = shalt.err (!%p2873_p2)
}
  0xa2   :  { %s2877_s24 = scalar_lea.vmem %s90_s28, 128  ;;  %p2882_p4 = scmp.lt.s32.totalorder %s90_s28, %s90_s28 }
  0xa3   :  { %p2878_p3 = scmp.ne.s32.totalorder %s90_s28, %s2877_s24  ;;  %p2883_p5 = scmp.lt.s32.totalorder %s2877_s24, %s2877_s24 }
  0xa5   :  { %p2884_p6 = por %p2883_p5, %p2882_p4 }
  0xa7   :  { %p2885_p7 = pnand %p2884_p6, %p2878_p3 }
  0xa9   :  { %2888 = shalt.err (!%p2885_p7)
}
  0xaa   :  { %92 = dma.hbm_to_vmem [thread:$0]  %s3605_s5, 128, %s90_s28, [#allocation9]  }
  0xab   :  { %s2889_s23 = scalar_lea.hbm %s3607_s7, 1024 }
  0xac   :  { %p2890_p8 = scmp.ne.s32.totalorder %s3607_s7, %s2889_s23  ;;  %p2893_p9 = scmp.lt.u32.totalorder %s2889_s23, %s3607_s7 }
  0xae   :  { %p2895_p10 = pnand %p2893_p9, %p2890_p8 }
  0xb0   :  { %2898 = shalt.err (!%p2895_p10)
}
  0xb1   :  { %s2899_s2 = scalar_lea.vmem %s111_s10, 1024  ;;  %p2904_p12 = scmp.lt.s32.totalorder %s111_s10, %s111_s10 }
  0xb2   :  { %p2900_p11 = scmp.ne.s32.totalorder %s111_s10, %s2899_s2  ;;  %p2905_p13 = scmp.lt.s32.totalorder %s2899_s2, %s2899_s2 }
  0xb4   :  { %p2906_p0 = por %p2905_p13, %p2904_p12 }
  0xb6   :  { %p2907_p1 = pnand %p2906_p0, %p2900_p11 }
  0xb8   :  { %2910 = shalt.err (!%p2907_p1)
}
  0xb9   :  { %116 = dma.hbm_to_vmem [thread:$0]  %s3607_s7, 1024, %s111_s10, [#allocation12], %s3062_s29, %s3062_s29, %s3063_s30  }
  0xba   :  { %s3072_s0 = smov [#allocation16]   ;;  %s3073_s19 = smov [#allocation19]  }
  0xbb   :  { %s134_s18 = sshll.u32 %s3072_s0, 4  ;;  %s161_s8 = sshll.u32 %s3073_s19, 4  ;;  %s135_s18 = int_to_ptr.vmem [resolvable:$true] %s134_s18  ;;  %s162_s8 = int_to_ptr.vmem [resolvable:$true] %s161_s8 }
  0xbc   :  { %s2911_s24 = scalar_lea.hbm %s3609_s9, 2048 }
  0xbd   :  { %p2912_p2 = scmp.ne.s32.totalorder %s3609_s9, %s2911_s24  ;;  %p2915_p3 = scmp.lt.u32.totalorder %s2911_s24, %s3609_s9 }
  0xbf   :  { %p2917_p4 = pnand %p2915_p3, %p2912_p2 }
  0xc1   :  { %2920 = shalt.err (!%p2917_p4)
}
  0xc2   :  { %s2921_s7 = scalar_lea.vmem %s135_s18, 2048  ;;  %p2926_p6 = scmp.lt.s32.totalorder %s135_s18, %s135_s18 }
  0xc3   :  { %p2922_p5 = scmp.ne.s32.totalorder %s135_s18, %s2921_s7  ;;  %p2927_p7 = scmp.lt.s32.totalorder %s2921_s7, %s2921_s7 }
  0xc5   :  { %p2928_p8 = por %p2927_p7, %p2926_p6 }
  0xc7   :  { %p2929_p9 = pnand %p2928_p8, %p2922_p5 }
  0xc9   :  { %2932 = shalt.err (!%p2929_p9)
}
  0xca   :  { %140 = dma.hbm_to_vmem [thread:$0]  %s3609_s9, 2048, %s135_s18, [#allocation15], %s3062_s29, %s3062_s29, %s3063_s30  }
  0xcb   :  { %s2933_s27 = scalar_lea.hbm %s3612_s12, 32 }
  0xcc   :  { %p2934_p10 = scmp.ne.s32.totalorder %s3612_s12, %s2933_s27  ;;  %p2937_p11 = scmp.lt.u32.totalorder %s2933_s27, %s3612_s12 }
  0xce   :  { %p2939_p12 = pnand %p2937_p11, %p2934_p10 }
  0xd0   :  { %2942 = shalt.err (!%p2939_p12)
}
  0xd1   :  { %s2943_s0 = scalar_lea.vmem %s162_s8, 32  ;;  %p2948_p0 = scmp.lt.s32.totalorder %s162_s8, %s162_s8 }
  0xd2   :  { %p2944_p13 = scmp.ne.s32.totalorder %s162_s8, %s2943_s0  ;;  %p2949_p1 = scmp.lt.s32.totalorder %s2943_s0, %s2943_s0 }
  0xd4   :  { %p2950_p2 = por %p2949_p1, %p2948_p0 }
  0xd6   :  { %p2951_p3 = pnand %p2950_p2, %p2944_p13 }
  0xd8   :  { %2954 = shalt.err (!%p2951_p3)
}
  0xd9   :  { %164 = dma.hbm_to_vmem [thread:$0]  %s3612_s12, 32, %s162_s8, [#allocation18]  }
  0xda   :  { %s3074_s30 = smov [#allocation20]   ;;  %s2955_s1 = scalar_lea.hbm %s3614_s14, 768 }
  0xdb   :  { %s172_s18 = sshll.u32 %s3074_s30, 4  ;;  %p2956_p4 = scmp.ne.s32.totalorder %s3614_s14, %s2955_s1  ;;  %s173_s18 = int_to_ptr.vmem [resolvable:$true] %s172_s18 }
  0xdc   :  { %p2959_p5 = scmp.lt.u32.totalorder %s2955_s1, %s3614_s14 }
  0xde   :  { %p2961_p6 = pnand %p2959_p5, %p2956_p4 }
  0xe0   :  { %2964 = shalt.err (!%p2961_p6)
}
  0xe1   :  { %s2965_s26 = scalar_lea.vmem %s173_s18, 768  ;;  %p2970_p8 = scmp.lt.s32.totalorder %s173_s18, %s173_s18 }
  0xe2   :  { %p2966_p7 = scmp.ne.s32.totalorder %s173_s18, %s2965_s26  ;;  %p2971_p9 = scmp.lt.s32.totalorder %s2965_s26, %s2965_s26 }
  0xe4   :  { %p2972_p10 = por %p2971_p9, %p2970_p8 }
  0xe6   :  { %p2973_p11 = pnand %p2972_p10, %p2966_p7 }
  0xe8   :  { %2976 = shalt.err (!%p2973_p11)
}
  0xe9   :  { %s3075_s12 = smov 384   ;;  %s3076_s8 = smov 24  }
  0xea   :  { %178 = dma.hbm_to_vmem [thread:$0]  %s3614_s14, 768, %s173_s18, [#allocation21], %s3075_s12, %s3075_s12, %s3076_s8  }
  0xeb   :  { %3043 = dma.done.wait [#allocation3], 16  }
  0xec   :  { %3044 = vsyncadd [#allocation3], 4294967280 }
  0xed   :  { %3045 = dma.done.wait [#allocation6], 3072  }
  0xee   :  { %3046 = vsyncadd [#allocation6], 4294964224 }
  0xef   :  { %3047 = dma.done.wait [#allocation9], 5248  }
  0xf0   :  { %3048 = vsyncadd [#allocation9], 4294962048 }
  0xf1   :  { %3049 = dma.done.wait [#allocation12], 5120  }
  0xf2   :  { %3050 = vsyncadd [#allocation12], 4294962176 }
  0xf3   :  { %3051 = dma.done.wait [#allocation15], 3072  }
  0xf4   :  { %3052 = vsyncadd [#allocation15], 4294964224 }
  0xf5   :  { %3053 = dma.done.wait [#allocation18], 2080  }
  0xf6   :  { %3054 = vsyncadd [#allocation18], 4294965216 }
  0xf7   :  { %3055 = dma.done.wait [#allocation21], 768  }
  0xf8   :  { %3056 = vsyncadd [#allocation21], 4294966528  ;;  %v3077_v0 = vmov 0.0|0.0   ;;  %vm3078_vm0 = vmmov 0   ;;  %v3079_v1 = vmov 0.0   ;;  %v242_v2 = vld [vmem:[#allocation7] sm:$0xff] }
  0xf9   :  { %2466 = vmatprep.subr.bf16.mxu0 %v3077_v0  ;;  %2478 = vmatprep.subr.bf16.mxu1 %v3077_v0  ;;  %v243_v3 = vld [vmem:[#allocation7 + $0x8] sm:$0xff]  ;;  %v226_v4 = vld [vmem:[#allocation5] sm:$0xff]  ;;  %v244_v7 = vld [vmem:[#allocation7 + $0x10] sm:$0xff]  ;;  %vm250_vm1 = vcmask 523264   ;;  %vm327_vm2 = vcmask 1041409   ;;  %vm688_vm3 = vcmask 1044480  }
  0xfa   :  { %2256 = vmatprep.mubr.msk.f32.mxu0 %vm3078_vm0, %v3079_v1  ;;  %2291 = vmatprep.mubr.msk.f32.mxu1 %vm3078_vm0, %v3079_v1  ;;  %v2467_v5 = vpack.c.bf16 %v243_v3, %v242_v2  ;;  %v227_v6 = vld [vmem:[#allocation5 + $0x8] sm:$0xff]  ;;  %v245_v8 = vld [vmem:[#allocation7 + $0x18] sm:$0xff]  ;;  %v228_v10 = vld [vmem:[#allocation5 + $0x10] sm:$0xff]  ;;  %vm681_vm4 = vcmask 39936   ;;  %s3641_s6 = sld [smem:[#allocation35_spill]]  ;;  %vm406_vm5 = vcmask 1041408  }
  0xfb   :  { %v2479_v9 = vpack.c.bf16 %v227_v6, %v226_v4  ;;  %v229_v11 = vld [vmem:[#allocation5 + $0x18] sm:$0xff]  ;;  %v2470_v12 = vpack.c.bf16 %v245_v8, %v244_v7  ;;  %v246_v14 = vld [vmem:[#allocation7 + $0x20] sm:$0xff]  ;;  %v247_v15 = vld [vmem:[#allocation7 + $0x28] sm:$0xff]  ;;  %vm1425_vm7 = vcmask 58368   ;;  %vm1495_vm9 = vcmask 64512  }
  0xfc   :  { %2468 = vmatpush3.bf16.msra.mxu0 %v2467_v5  ;;  %v2482_v13 = vpack.c.bf16 %v229_v11, %v228_v10  ;;  %v230_v16 = vld [vmem:[#allocation5 + $0x20] sm:$0xff]  ;;  %v231_v17 = vld [vmem:[#allocation5 + $0x28] sm:$0xff]  ;;  %v2473_v18 = vpack.c.bf16 %v247_v15, %v246_v14  ;;  %v248_v20 = vld [vmem:[#allocation7 + $0x30] sm:$0xff] }
  0xfd   :  { %2480 = vmatpush3.bf16.msra.mxu1 %v2479_v9  ;;  %2469 = vmatprep.subr.bf16.mxu0 %v3077_v0  ;;  %v2485_v19 = vpack.c.bf16 %v231_v17, %v230_v16  ;;  %v249_v21 = vld [vmem:[#allocation7 + $0x38] sm:$0xff]  ;;  %v232_v22 = vld [vmem:[#allocation5 + $0x30] sm:$0xff]  ;;  %v453_v24 = vld [vmem:[#allocation8 + $0x80] sm:$0xff] }
  0xfe   :  { %2481 = vmatprep.subr.bf16.mxu1 %v3077_v0  ;;  %v233_v23 = vld [vmem:[#allocation5 + $0x38] sm:$0xff]  ;;  %v454_v25 = vld [vmem:[#allocation8 + $0x88] sm:$0xff]  ;;  %v2476_v26 = vpack.c.bf16 %v249_v21, %v248_v20  ;;  %v234_v29 = vld [vmem:[#allocation5 + $0x40] sm:$0xff] }
  0xff   :  { %v2488_v27 = vpack.c.bf16 %v233_v23, %v232_v22  ;;  %v2502_v28 = vpack.c.bf16 %v454_v25, %v453_v24  ;;  %v437_v30 = vld [vmem:[#allocation8] sm:$0xff]  ;;  %v438_v31 = vld [vmem:[#allocation8 + $0x8] sm:$0xff]  ;;  %v455_v33 = vld [vmem:[#allocation8 + $0x90] sm:$0xff] }
 0x100   :  { %2471 = vmatpush3.bf16.msra.mxu0 %v2470_v12  ;;  %v235_v32 = vld [vmem:[#allocation5 + $0x48] sm:$0xff]  ;;  %v456_v34 = vld [vmem:[#allocation8 + $0x98] sm:$0xff]  ;;  %v2504_v36 = vpack.c.bf16 %v438_v31, %v437_v30  ;;  %v236_v39 = vld [vmem:[#allocation5 + $0x50] sm:$0xff] }
 0x101   :  { %2483 = vmatpush3.bf16.msra.mxu1 %v2482_v13  ;;  %2472 = vmatprep.subr.bf16.mxu0 %v3077_v0  ;;  %v225_v35 = vld [vmem:[#allocation19] sm:$0x3]  ;;  %v2491_v37 = vpack.c.bf16 %v235_v32, %v234_v29  ;;  %v2506_v38 = vpack.c.bf16 %v456_v34, %v455_v33  ;;  %v439_v40 = vld [vmem:[#allocation8 + $0x10] sm:$0xff]  ;;  %v440_v41 = vld [vmem:[#allocation8 + $0x18] sm:$0xff] }
 0x102   :  { %2484 = vmatprep.subr.bf16.mxu1 %v3077_v0  ;;  %v237_v42 = vld [vmem:[#allocation5 + $0x58] sm:$0xff]  ;;  %v457_v43 = vld [vmem:[#allocation8 + $0xa0] sm:$0xff]  ;;  %v458_v44 = vld [vmem:[#allocation8 + $0xa8] sm:$0xff]  ;;  %v2508_v45 = vpack.c.bf16 %v440_v41, %v439_v40 }
 0x103   :  { %v2494_v46 = vpack.c.bf16 %v237_v42, %v236_v39  ;;  %v2510_v47 = vpack.c.bf16 %v458_v44, %v457_v43  ;;  %v238_v48 = vld [vmem:[#allocation5 + $0x60] sm:$0xff]  ;;  %v442_v50 = vld [vmem:[#allocation8 + $0x28] sm:$0xff]  ;;  %v459_v52 = vld [vmem:[#allocation8 + $0xb0] sm:$0xff] }
 0x104   :  { %2474 = vmatpush3.bf16.msra.mxu0 %v2473_v18  ;;  %v441_v49 = vld [vmem:[#allocation8 + $0x20] sm:$0xff]  ;;  %v239_v51 = vld [vmem:[#allocation5 + $0x68] sm:$0xff]  ;;  %v460_v53 = vld [vmem:[#allocation8 + $0xb8] sm:$0xff] }
 0x105   :  { %2486 = vmatpush3.bf16.msra.mxu1 %v2485_v19  ;;  %2475 = vmatprep.subr.bf16.mxu0 %v3077_v0  ;;  %v432_v54 = vld [vmem:[%s3613_s13 + $0x8] sm:$0xff]  ;;  %v2512_v55 = vpack.c.bf16 %v442_v50, %v441_v49  ;;  %v240_v56 = vld [vmem:[#allocation5 + $0x70] sm:$0xff]  ;;  %v2497_v57 = vpack.c.bf16 %v239_v51, %v238_v48  ;;  %v2514_v58 = vpack.c.bf16 %v460_v53, %v459_v52  ;;  %v241_v59 = vld [vmem:[#allocation5 + $0x78] sm:$0xff] }
 0x106   :  { %2487 = vmatprep.subr.bf16.mxu1 %v3077_v0  ;;  %v443_v60 = vld [vmem:[#allocation8 + $0x30] sm:$0xff]  ;;  %v444_v61 = vld [vmem:[#allocation8 + $0x38] sm:$0xff]  ;;  %v224_v62 = vld [vmem:[%s3611_s11 + $0x8] sm:$0xff]  ;;  %v2500_v6 = vpack.c.bf16 %v241_v59, %v240_v56 }
 0x107   :  { %v461_v63 = vld [vmem:[#allocation8 + $0xc0] sm:$0xff]  ;;  %v462_v2 = vld [vmem:[#allocation8 + $0xc8] sm:$0xff]  ;;  %v2516_v5 = vpack.c.bf16 %v444_v61, %v443_v60  ;;  %v326_v7 = vrot.slane %v224_v62, 7  ;;  %v463_v13 = vld [vmem:[#allocation8 + $0xd0] sm:$0xff] }
 0x108   :  { %2477 = vmatpush3.bf16.msra.mxu0 %v2476_v26  ;;  %v469_v3 = vld [vmem:[#allocation8 + $0x100] sm:$0xff]  ;;  %v470_v4 = vld [vmem:[#allocation8 + $0x108] sm:$0xff]  ;;  %v2518_v8 = vpack.c.bf16 %v462_v2, %v461_v63  ;;  %v464_v14 = vld [vmem:[#allocation8 + $0xd8] sm:$0xff] }
 0x109   :  { %2489 = vmatpush3.bf16.msra.mxu1 %v2488_v27  ;;  %2503 = vmatprep.subr.bf16.mxu0 %v2502_v28  ;;  %v445_v9 = vld [vmem:[#allocation8 + $0x40] sm:$0xff]  ;;  %v446_v10 = vld [vmem:[#allocation8 + $0x48] sm:$0xff]  ;;  %v2534_v12 = vpack.c.bf16 %v470_v4, %v469_v3  ;;  %v471_v15 = vld [vmem:[#allocation8 + $0x110] sm:$0xff]  ;;  %v2522_v19 = vpack.c.bf16 %v464_v14, %v463_v13 }
 0x10a   :  { %2490 = vmatprep.subr.bf16.mxu1 %v3077_v0  ;;  %v223_v11 = vld [vmem:[%s3611_s11] sm:$0xff]  ;;  %v2520_v17 = vpack.c.bf16 %v446_v10, %v445_v9  ;;  %v447_v20 = vld [vmem:[#allocation8 + $0x50] sm:$0xff]  ;;  %v466_v24 = vld [vmem:[#allocation8 + $0xe8] sm:$0xff] }
 0x10b   :  { %2257 = vmatmul.mubr.msk.f32.vlgmr.msra.gmra.mrb[0].mxu0 %vm250_vm1, %v225_v35  ;;  %v472_v16 = vld [vmem:[#allocation8 + $0x118] sm:$0xff]  ;;  %v328_v18 = vsel %vm327_vm2, %v326_v7, %v223_v11  ;;  %v465_v23 = vld [vmem:[#allocation8 + $0xe0] sm:$0xff]  ;;  %v474_v26 = vld [vmem:[#allocation8 + $0x128] sm:$0xff] }
 0x10c   :  { %2505 = vmatpush3.bf16.msra.mxu0 %v2504_v36  ;;  %551 = vmatprep.mubr.f32.mxu0 %v432_v54  ;;  %v448_v21 = vld [vmem:[#allocation8 + $0x58] sm:$0xff]  ;;  %v2538_v22 = vpack.c.bf16 %v472_v16, %v471_v15  ;;  %v473_v25 = vld [vmem:[#allocation8 + $0x120] sm:$0xff]  ;;  %v433_v27 = vld [vmem:[%s3613_s13 + $0x10] sm:$0xff]  ;;  %v2526_v29 = vpack.c.bf16 %v466_v24, %v465_v23 }
 0x10d   :  { %2492 = vmatpush3.bf16.msra.mxu1 %v2491_v37  ;;  %2507 = vmatprep.subr.bf16.mxu0 %v2506_v38  ;;  %v2524_v28 = vpack.c.bf16 %v448_v21, %v447_v20  ;;  %v449_v30 = vld [vmem:[#allocation8 + $0x60] sm:$0xff]  ;;  %v450_v31 = vld [vmem:[#allocation8 + $0x68] sm:$0xff]  ;;  %v2542_v32 = vpack.c.bf16 %v474_v26, %v473_v25  ;;  %v467_v33 = vld [vmem:[#allocation8 + $0xf0] sm:$0xff] }
 0x10e   :  { %2493 = vmatprep.subr.bf16.mxu1 %v3077_v0  ;;  %v468_v34 = vld [vmem:[#allocation8 + $0xf8] sm:$0xff]  ;;  %v475_v35 = vld [vmem:[#allocation8 + $0x130] sm:$0xff]  ;;  %v2528_v37 = vpack.c.bf16 %v450_v31, %v449_v30  ;;  %v673_v43 = vld [vmem:[#allocation10] sm:$0x1f] }
 0x10f   :  { %v476_v36 = vld [vmem:[#allocation8 + $0x138] sm:$0xff]  ;;  %v2530_v38 = vpack.c.bf16 %v468_v34, %v467_v33  ;;  %v451_v39 = vld [vmem:[#allocation8 + $0x70] sm:$0xff]  ;;  %v672_v49 = vld [vmem:[%s3615_s15 + $0x8] sm:$0xff] }
 0x110   :  { %2509 = vmatpush3.bf16.msra.mxu0 %v2508_v45  ;;  %v452_v40 = vld [vmem:[#allocation8 + $0x78] sm:$0xff]  ;;  %v2546_v41 = vpack.c.bf16 %v476_v36, %v475_v35  ;;  %v436_v45 = vld [vmem:[%s3613_s13 + $0x28] sm:$0xff]  ;;  %v790_v51 = vld [vmem:[#allocation11 + $0x88] sm:$0xff] }
 0x111   :  { %2495 = vmatpush3.bf16.msra.mxu1 %v2494_v46  ;;  %2511 = vmatprep.subr.bf16.mxu0 %v2510_v47  ;;  %v2532_v42 = vpack.c.bf16 %v452_v40, %v451_v39  ;;  %v431_v44 = vld [vmem:[%s3613_s13] sm:$0xff]  ;;  %v434_v48 = vld [vmem:[%s3613_s13 + $0x18] sm:$0xff]  ;;  %v789_v50 = vld [vmem:[#allocation11 + $0x80] sm:$0xff] }
 0x112   :  { %2496 = vmatprep.subr.bf16.mxu1 %v3077_v0  ;;  %v435_v46 = vld [vmem:[%s3613_s13 + $0x20] sm:$0xff]  ;;  %v2566_v52 = vpack.c.bf16 %v790_v51, %v789_v50  ;;  %v773_v53 = vld [vmem:[#allocation11] sm:$0xff]  ;;  %v774_v54 = vld [vmem:[#allocation11 + $0x8] sm:$0xff] }
 0x113   :  { %v671_v47 = vld [vmem:[%s3615_s15] sm:$0xff]  ;;  %v805_v62 = vld [vmem:[#allocation13] sm:$0xff]  ;;  %v806_v63 = vld [vmem:[#allocation13 + $0x8] sm:$0xff] }
 0x114   :  { %2513 = vmatpush3.bf16.msra.mxu0 %v2512_v55  ;;  %v2568_v55 = vpack.c.bf16 %v774_v54, %v773_v53  ;;  %v791_v56 = vld [vmem:[#allocation11 + $0x90] sm:$0xff]  ;;  %v776_v60 = vld [vmem:[#allocation11 + $0x18] sm:$0xff]  ;;  %v793_v2 = vld [vmem:[#allocation11 + $0xa0] sm:$0xff]  ;;  %v2550_v3 = vpack.c.bf16 %v806_v63, %v805_v62 }
 0x115   :  { %2498 = vmatpush3.bf16.msra.mxu1 %v2497_v57  ;;  %2515 = vmatprep.subr.bf16.mxu0 %v2514_v58  ;;  %v792_v57 = vld [vmem:[#allocation11 + $0x98] sm:$0xff]  ;;  %v775_v59 = vld [vmem:[#allocation11 + $0x10] sm:$0xff]  ;;  %v794_v4 = vld [vmem:[#allocation11 + $0xa8] sm:$0xff] }
 0x116   :  { %2499 = vmatprep.subr.bf16.mxu1 %v3077_v0  ;;  %v2570_v58 = vpack.c.bf16 %v792_v57, %v791_v56  ;;  %v2572_v61 = vpack.c.bf16 %v776_v60, %v775_v59  ;;  %v2574_v7 = vpack.c.bf16 %v794_v4, %v793_v2  ;;  %v807_v9 = vld [vmem:[#allocation13 + $0x10] sm:$0xff]  ;;  %v808_v10 = vld [vmem:[#allocation13 + $0x18] sm:$0xff]  ;;  %v797_v20 = vld [vmem:[#allocation11 + $0xc0] sm:$0xff]  ;;  %v400_v57 = vlaneseq }
 0x117   :  { %v795_v11 = vld [vmem:[#allocation11 + $0xb0] sm:$0xff]  ;;  %v796_v13 = vld [vmem:[#allocation11 + $0xb8] sm:$0xff]  ;;  %v781_v23 = vld [vmem:[#allocation11 + $0x40] sm:$0xff] }
 0x118   :  { %2517 = vmatpush3.bf16.msra.mxu0 %v2516_v5  ;;  %v777_v5 = vld [vmem:[#allocation11 + $0x20] sm:$0xff]  ;;  %v779_v14 = vld [vmem:[#allocation11 + $0x30] sm:$0xff]  ;;  %v780_v15 = vld [vmem:[#allocation11 + $0x38] sm:$0xff]  ;;  %v2578_v16 = vpack.c.bf16 %v796_v13, %v795_v11 }
 0x119   :  { %2501 = vmatpush3.bf16.msra.mxu1 %v2500_v6  ;;  %2519 = vmatprep.subr.bf16.mxu0 %v2518_v8  ;;  %v778_v6 = vld [vmem:[#allocation11 + $0x28] sm:$0xff]  ;;  %v800_v31 = vld [vmem:[#allocation11 + $0xd8] sm:$0xff]  ;;  %v801_v36 = vld [vmem:[#allocation11 + $0xe0] sm:$0xff] }
 0x11a   :  { %2535 = vmatprep.subr.bf16.mxu1 %v2534_v12  ;;  %v2576_v8 = vpack.c.bf16 %v778_v6, %v777_v5  ;;  %v782_v24 = vld [vmem:[#allocation11 + $0x48] sm:$0xff]  ;;  %v784_v33 = vld [vmem:[#allocation11 + $0x58] sm:$0xff] }
 0x11b   :  { %v2584_v26 = vpack.c.bf16 %v782_v24, %v781_v23  ;;  %v970_v40 = vld [vmem:[#allocation14 + $0x8] sm:$0xff]  ;;  %v770_v54 = vld [vmem:[#allocation20 + $0x18] sm:$0xff] }
 0x11c   :  { %2292 = vmatmul.mubr.f32.vlgmr.msra.gmra.mrb[0].mxu1 %v328_v18  ;;  %2521 = vmatpush3.bf16.msra.mxu0 %v2520_v17  ;;  %v2580_v17 = vpack.c.bf16 %v780_v15, %v779_v14  ;;  %v809_v18 = vld [vmem:[#allocation13 + $0x20] sm:$0xff]  ;;  %v768_v51 = vld [vmem:[#allocation20 + $0x8] sm:$0xff]  ;;  %v3419_v60 = vld [vmem:[%s3641_s6] sm:$0xff] }
 0x11d   :  { %2537 = vmatpush3.bf16.msra.mxu1 %v2534_v12  ;;  %2523 = vmatprep.subr.bf16.mxu0 %v2522_v19  ;;  %v2554_v12 = vpack.c.bf16 %v808_v10, %v807_v9  ;;  %v810_v19 = vld [vmem:[#allocation13 + $0x28] sm:$0xff]  ;;  %v2043_v15 = vld [vmem:[#allocation2] ss:$0 sm:$0xff] }
 0x11e   :  { %2539 = vmatprep.subr.bf16.mxu1 %v2538_v22  ;;  %2310 = vmatprep.mubr.msk.f32.mxu1 %vm250_vm1, %v433_v27  ;;  %v2558_v21 = vpack.c.bf16 %v810_v19, %v809_v18  ;;  %v811_v27 = vld [vmem:[#allocation13 + $0x30] sm:$0xff]  ;;  %v771_v53 = vld [vmem:[#allocation20 + $0x20] sm:$0xff]  ;;  %v972_v19 = vld [vmem:[#allocation14 + $0x18] sm:$0xff] }
 0x11f   :  { %v971_v18 = vld [vmem:[#allocation14 + $0x10] sm:$0xff] }
 0x120   :  { %2525 = vmatpush3.bf16.msra.mxu0 %v2524_v28  ;;  %v812_v28 = vld [vmem:[#allocation13 + $0x38] sm:$0xff] }
 0x121   :  { %2541 = vmatpush3.bf16.msra.mxu1 %v2538_v22  ;;  %2527 = vmatprep.subr.bf16.mxu0 %v2526_v29  ;;  %v798_v22 = vld [vmem:[#allocation11 + $0xc8] sm:$0xff]  ;;  %v799_v29 = vld [vmem:[#allocation11 + $0xd0] sm:$0xff]  ;;  %v2562_v30 = vpack.c.bf16 %v812_v28, %v811_v27  ;;  %v973_v28 = vld [vmem:[#allocation14 + $0x20] sm:$0xff] }
 0x122   :  { %2543 = vmatprep.subr.bf16.mxu1 %v2542_v32  ;;  %v2582_v25 = vpack.c.bf16 %v798_v22, %v797_v20  ;;  %v2586_v34 = vpack.c.bf16 %v800_v31, %v799_v29  ;;  %v769_v27 = vld [vmem:[#allocation20 + $0x10] sm:$0xff]  ;;  %v974_v29 = vld [vmem:[#allocation14 + $0x28] sm:$0xff] }
 0x123   :  { %v2606_v31 = vpack.c.bf16 %v974_v29, %v973_v28 }
 0x124   :  { %2529 = vmatpush3.bf16.msra.mxu0 %v2528_v37  ;;  %v802_v37 = vld [vmem:[#allocation11 + $0xe8] sm:$0xff] }
 0x125   :  { %2545 = vmatpush3.bf16.msra.mxu1 %v2542_v32  ;;  %2531 = vmatprep.subr.bf16.mxu0 %v2530_v38  ;;  %v783_v32 = vld [vmem:[#allocation11 + $0x50] sm:$0xff]  ;;  %v969_v38 = vld [vmem:[#allocation14] sm:$0xff]  ;;  %v2590_v39 = vpack.c.bf16 %v802_v37, %v801_v36 }
 0x126   :  { %2547 = vmatprep.subr.bf16.mxu1 %v2546_v41  ;;  %v2588_v35 = vpack.c.bf16 %v784_v33, %v783_v32  ;;  %v975_v32 = vld [vmem:[#allocation14 + $0x30] sm:$0xff]  ;;  %v976_v33 = vld [vmem:[#allocation14 + $0x38] sm:$0xff] }
 0x128   :  { %2533 = vmatpush3.bf16.msra.mxu0 %v2532_v42  ;;  %v786_v42 = vld [vmem:[#allocation11 + $0x68] sm:$0xff] }
 0x129   :  { %2549 = vmatpush3.bf16.msra.mxu1 %v2546_v41  ;;  %2551 = vmatprep.subr.bf16.mxu0 %v2550_v3  ;;  %v785_v41 = vld [vmem:[#allocation11 + $0x60] sm:$0xff] }
 0x12a   :  { %2313 = vmatprep.subr.msk.mxu1 %vm688_vm3, %v673_v43 }
 0x12b   :  { %552 = vmatmul.mubr.f32.vlgmr.msra.gmra.mrb[2].mxu0 %v431_v44  ;;  %v2592_v44 = vpack.c.bf16 %v786_v42, %v785_v41 }
 0x12c   :  { %2311 = vmatmul.mubr.msk.f32.vlgmr.msra.gmra.mrb[2].mxu1 %vm250_vm1, %v436_v45  ;;  %556 = vmatprep.mubr.f32.mxu0 %v435_v46  ;;  %v803_v45 = vld [vmem:[#allocation11 + $0xf0] sm:$0xff]  ;;  %v804_v46 = vld [vmem:[#allocation11 + $0xf8] sm:$0xff] }
 0x12d   :  { %2314 = vmatpush3.msk.msra.mxu1 %vm688_vm3, %v673_v43  ;;  %2315 = vmatprep.mubr.msk.f32.mxu1 %vm681_vm4, %v671_v47  ;;  %v3407_v43 = vpack.c.bf16 %v970_v40, %v969_v38  ;;  %v2594_v47 = vpack.c.bf16 %v804_v46, %v803_v45 }
 0x12e   :  { %2567 = vmatprep.subr.bf16.mxu1 %v2566_v52  ;;  %2553 = vmatpush3.bf16.msra.mxu0 %v2550_v3  ;;  %v767_v52 = vld [vmem:[#allocation20] sm:$0xff] }
 0x12f   :  { %557 = vmatmul.mubr.f32.gmra.mrb[4].mxu0 %v434_v48  ;;  %2555 = vmatprep.subr.bf16.mxu0 %v2554_v12  ;;  %v787_v48 = vld [vmem:[#allocation11 + $0x70] sm:$0xff] }
 0x130   :  { %2316 = vmatmul.mubr.msk.f32.vlgmr.msra.gmra.mrb[4].mxu1 %vm681_vm4, %v672_v49  ;;  %v788_v49 = vld [vmem:[#allocation11 + $0x78] sm:$0xff] }
 0x131   :  { %2569 = vmatpush3.bf16.msra.mxu1 %v2568_v55  ;;  %v2596_v50 = vpack.c.bf16 %v788_v49, %v787_v48  ;;  %958 = vmatprep.mubr.f32.mxu1 %v768_v51 }
 0x132   :  { %2571 = vmatprep.subr.bf16.mxu1 %v2570_v58  ;;  %2557 = vmatpush3.bf16.msra.mxu0 %v2554_v12  ;;  %v3413_v58 = vshrl.u32 %v400_v57, 7 }
 0x133   :  { %2559 = vmatprep.subr.bf16.mxu0 %v2558_v21 }
 0x134   :  { %v402_v59 = vsub.s32 0, %v3413_v58  ;;  %v479_v4 = vsub.s32 3, %v3413_v58 }
 0x135   :  { %2573 = vmatpush3.bf16.msra.mxu1 %v2572_v61 }
 0x136   :  { %2575 = vmatprep.subr.bf16.mxu1 %v2574_v7  ;;  %2561 = vmatpush3.bf16.msra.mxu0 %v2558_v21  ;;  %v403_v61 = vrot.slane %v3419_v60, %v402_v59  ;;  %v480_v7 = vrot.slane %v3419_v60, %v479_v4 }
 0x137   :  { %2563 = vmatprep.subr.bf16.mxu0 %v2562_v30 }
 0x139   :  { %2577 = vmatpush3.bf16.msra.mxu1 %v2576_v8 }
 0x13a   :  { %2579 = vmatprep.subr.bf16.mxu1 %v2578_v16  ;;  %2565 = vmatpush3.bf16.msra.mxu0 %v2562_v30 }
 0x13b   :  { %2599 = vmatprep.subr.bf16.mxu0 %v3407_v43 }
 0x13d   :  { %2581 = vmatpush3.bf16.msra.mxu1 %v2580_v17 }
 0x13e   :  { %2583 = vmatprep.subr.bf16.mxu1 %v2582_v25 }
 0x141   :  { %2585 = vmatpush3.bf16.msra.mxu1 %v2584_v26  ;;  %v2602_v26 = vpack.c.bf16 %v972_v19, %v971_v18 }
 0x142   :  { %2587 = vmatprep.subr.bf16.mxu1 %v2586_v34  ;;  %v2610_v34 = vpack.c.bf16 %v976_v33, %v975_v32 }
 0x145   :  { %2589 = vmatpush3.bf16.msra.mxu1 %v2588_v35  ;;  %v772_v35 = vld [vmem:[#allocation20 + $0x28] sm:$0xff] }
 0x146   :  { %2591 = vmatprep.subr.bf16.mxu1 %v2590_v39 }
 0x149   :  { %2593 = vmatpush3.bf16.msra.mxu1 %v2592_v44 }
 0x14a   :  { %2595 = vmatprep.subr.bf16.mxu1 %v2594_v47 }
 0x14d   :  { %2597 = vmatpush3.bf16.msra.mxu1 %v2596_v50 }
 0x14e   :  { %2371 = vmatprep.subr.mxu1 %v3079_v1 }
 0x150   :  { %959 = vmatmul.mubr.f32.vlgmr.msra.gmra.mrb[6].mxu1 %v767_v52 }
 0x151   :  { %963 = vmatprep.mubr.f32.mxu1 %v771_v53 }
 0x154   :  { %964 = vmatmul.mubr.f32.gmra.mrb[8].mxu1 %v770_v54 }
 0x155   :  { %2373 = vmatprep.mubr.msk.f32.mxu1 %vm3078_vm0, %v3079_v1 }
 0x1de   :  { %v320_v55 = vpop.f32.mrb[0].mxu0 }
 0x1df   :  { %v2258_v56 = vpop.f32.mrb[1].mxu0 }
 0x1ef   :  { %v396_v62 = vpop.f32.mrb[0].mxu1 }
 0x1f0   :  { %v397_v63 = vadd.f32 %v396_v62, %v320_v55  ;;  %v2293_v2 = vpop.f32.mrb[1].mxu1 }
 0x1f2   :  { %v404_v3 = vadd.f32 %v403_v61, %v397_v63 }
 0x1f4   :  { %2693 = vtanh.f32 %v404_v3 }
 0x1fe   :  { %v2694_v5 = vpop.eup %2693  ;;  %v2113_v6 = vpop.f32.mrb[2].mxu0 }
 0x1ff   :  { %v2312_v8 = vpop.f32.mrb[2].mxu1  ;;  %v2114_v9 = vpop.f32.mrb[3].mxu0  ;;  %v407_v10 = vsel %vm406_vm5, %v2694_v5, 0.0 }
 0x200   :  { %v2115_v11 = vadd.f32 %v2114_v9, %v2113_v6  ;;  %v628_v12 = vpop.f32.mrb[3].mxu1  ;;  %408 = vadd.xlane.f32.xlu0 %v407_v10 }
 0x202   :  { %v554_v13 = vadd.f32 %v2115_v11, %v480_v7  ;;  %v2116_v14 = vpop.f32.mrb[4].mxu0 }
 0x203   :  { %v2317_v16 = vpop.f32.mrb[4].mxu1  ;;  %v2117_v17 = vpop.f32.mrb[5].mxu0 }
 0x204   :  { %v629_v20 = vadd.f32 %v628_v12, %v554_v13  ;;  %v2118_v21 = vadd.f32 %v2117_v17, %v2116_v14  ;;  %v758_v22 = vpop.f32.mrb[5].mxu1  ;;  %v764_v24 = vadd.f32 %v2317_v16, %v2043_v15 }
 0x205   :  { %v759_v23 = vadd.f32 %v2043_v15, %v758_v22  ;;  %v423_v22 = vsub.s32 1, %v3413_v58 }
 0x206   :  { %v559_v25 = vadd.f32 %v2118_v21, %v480_v7  ;;  %637 = vadd.xlane.f32.xlu0 %v629_v20 }
 0x207   :  { %2334 = vmatprep.mubr.msk.f32.mxu0 %vm250_vm1, %v759_v23  ;;  %v3080_v23 = vmov 1966171168   ;;  %v424_v28 = vrot.slane %v3419_v60, %v423_v22 }
 0x208   :  { %2335 = vmatmul.mubr.msk.f32.vlgmr.msra.gmra.mrb[6].mxu0 %vm250_vm1, %v764_v24  ;;  %v634_v30 = vadd.f32 %v2312_v8, %v559_v25  ;;  %v1102_v24 = vunpack.c.l.s4 %v3080_v23  ;;  %v661_v25 = vsub.s32 4, %v3413_v58 }
 0x209   :  { %2601 = vmatpush3.bf16.msra.mxu0 %v3407_v43  ;;  %2353 = vmatprep.mubr.msk.f32.mxu0 %vm250_vm1, %v769_v27  ;;  %v1062_v43 = vsub.s32 6, %v3413_v58  ;;  %v667_v27 = vsub.s32 5, %v3413_v58 }
 0x20a   :  { %2603 = vmatprep.subr.bf16.mxu0 %v2602_v26  ;;  %639 = vadd.xlane.f32.xlu1 %v634_v30  ;;  %v1103_v29 = vunpack.c.0.s8 %v1102_v24 }
 0x20b   :  { %v1063_v46 = vrot.slane %v3419_v60, %v1062_v43 }
 0x20d   :  { %2605 = vmatpush3.bf16.msra.mxu0 %v2602_v26  ;;  %v428_v26 = vsub.s32 2, %v3413_v58 }
 0x20e   :  { %2607 = vmatprep.subr.bf16.mxu0 %v2606_v31 }
 0x211   :  { %2609 = vmatpush3.bf16.msra.mxu0 %v2606_v31  ;;  %v662_v31 = vrot.slane %v3419_v60, %v661_v25 }
 0x212   :  { %2611 = vmatprep.subr.bf16.mxu0 %v2610_v34 }
 0x215   :  { %2613 = vmatpush3.bf16.msra.mxu0 %v2610_v34  ;;  %v429_v34 = vrot.slane %v3419_v60, %v428_v26 }
 0x216   :  { %2356 = vmatprep.subr.mxu0 %v3079_v1 }
 0x218   :  { %2354 = vmatmul.mubr.msk.f32.vlgmr.msra.gmra.mrb[6].mxu0 %vm250_vm1, %v772_v35 }
 0x219   :  { %2358 = vmatprep.mubr.msk.f32.mxu0 %vm3078_vm0, %v3079_v1 }
 0x223   :  { %v2174_v36 = vpop.f32.mrb[6].mxu1 }
 0x224   :  { %v2175_v37 = vpop.f32.mrb[7].mxu1 }
 0x225   :  { %v2176_v38 = vadd.f32 %v2175_v37, %v2174_v36  ;;  %v668_v36 = vrot.slane %v3419_v60, %v667_v27 }
 0x227   :  { %v2177_v39 = vpop.f32.mrb[8].mxu1 }
 0x228   :  { %v2178_v40 = vpop.f32.mrb[9].mxu1 }
 0x229   :  { %v2179_v41 = vadd.f32 %v2178_v40, %v2177_v39 }
 0x28d   :  { %v409_v42 = vpop.xlane.xlu0 %408 }
 0x28e   :  { %v411_v44 = vmul.f32 0.0078125, %v409_v42 }
 0x290   :  { %v412_v47 = vsub.f32 %v2694_v5, %v411_v44 }
 0x292   :  { %v413_v61 = vmul.f32 %v412_v47, %v412_v47 }
 0x293   :  { %v638_v45 = vpop.xlane.xlu0 %637 }
 0x294   :  { %v641_v48 = vmul.f32 0.0078125, %v638_v45  ;;  %v414_v63 = vsel %vm406_vm5, %v413_v61, 0.0 }
 0x296   :  { %v643_v56 = vsub.f32 %v629_v20, %v641_v48 }
 0x297   :  { %v640_v49 = vpop.xlane.xlu1 %639 }
 0x298   :  { %v642_v54 = vmul.f32 0.0078125, %v640_v49  ;;  %v645_v2 = vmul.f32 %v643_v56, %v643_v56 }
 0x29a   :  { %v644_v62 = vsub.f32 %v634_v30, %v642_v54 }
 0x29c   :  { %v646_v3 = vmul.f32 %v644_v62, %v644_v62 }
 0x2eb   :  { %v2355_v50 = vpop.f32.mrb[6].mxu0 }
 0x2ec   :  { %v2662_v51 = vadd.f32 %v2355_v50, %v2179_v41  ;;  %v1049_v52 = vpop.f32.mrb[7].mxu0 }
 0x2ed   :  { %v2663_v53 = vadd.f32 %v2176_v38, %v1049_v52  ;;  %v3461_v38 = vsub.s32 %v1103_v29, %v3413_v58 }
 0x2ee   :  { %v1065_v55 = vadd.f32 %v2662_v51, %v1063_v46 }
 0x2ef   :  { %v1064_v57 = vadd.f32 %v2663_v53, %v1063_v46 }
 0x2f0   :  { %1068 = vadd.xlane.f32.xlu1 %v1065_v55 }
 0x2f1   :  { %1066 = vadd.xlane.f32.xlu0 %v1064_v57 }
 0x2f4   :  { %415 = vadd.xlane.f32.xlu1 %v414_v63 }
 0x2f5   :  { %647 = vadd.xlane.f32.xlu0 %v645_v2 }
 0x2f8   :  { %649 = vadd.xlane.f32.xlu1 %v646_v3 }
 0x37d   :  { %v1069_v5 = vpop.xlane.xlu1 %1068 }
 0x37e   :  { %v1071_v6 = vmul.f32 0.0078125, %v1069_v5  ;;  %v1067_v7 = vpop.xlane.xlu0 %1066 }
 0x37f   :  { %v1070_v8 = vmul.f32 0.0078125, %v1067_v7 }
 0x380   :  { %v3440_v9 = vsub.f32 %v1065_v55, %v1071_v6 }
 0x381   :  { %v3442_v10 = vsub.f32 %v1064_v57, %v1070_v8  ;;  %v416_v11 = vpop.xlane.xlu1 %415  ;;  %v3485_v57 = vld [vmem:[%s3641_s6 + $0x8] sm:$0xf] }
 0x382   :  { %v417_v12 = vmul.f32 0.0078125, %v416_v11  ;;  %v648_v13 = vpop.xlane.xlu0 %647  ;;  %v1075_v14 = vmul.f32 %v3440_v9, %v3440_v9  ;;  %v1097_v2 = vrot.slane %v3485_v57, %v402_v59 }
 0x383   :  { %v651_v15 = vmul.f32 0.0078125, %v648_v13  ;;  %v1074_v16 = vmul.f32 %v3442_v10, %v3442_v10 }
 0x384   :  { %v418_v17 = vadd.f32 1e-12, %v417_v12  ;;  %1078 = vadd.xlane.f32.xlu0 %v1075_v14 }
 0x385   :  { %v653_v18 = vadd.f32 1e-12, %v651_v15  ;;  %v650_v19 = vpop.xlane.xlu1 %649  ;;  %1076 = vadd.xlane.f32.xlu1 %v1074_v16 }
 0x386   :  { %2695 = vrsqrt.f32 %v418_v17  ;;  %v652_v20 = vmul.f32 0.0078125, %v650_v19 }
 0x387   :  { %2697 = vrsqrt.f32 %v653_v18 }
 0x388   :  { %v654_v21 = vadd.f32 1e-12, %v652_v20  ;;  %v1417_v20 = vld [vmem:[%s3617_s17] sm:$0x3] }
 0x389   :  { %vm1418_vm8 = vcmp.gt.f32.partialorder %v1417_v20, 0.5  ;;  %v1791_v20 = vld [vmem:[#allocation16 + $0x38] sm:$0xff] }
 0x38a   :  { %2699 = vrsqrt.f32 %v654_v21 }
 0x390   :  { %v2696_v30 = vpop.eup %2695 }
 0x391   :  { %v2698_v32 = vpop.eup %2697  ;;  %v420_v33 = vmul.f32 %v2696_v30, %v412_v47 }
 0x392   :  { %v657_v35 = vmul.f32 %v2698_v32, %v643_v56  ;;  %v1090_v56 = vsub.s32 7, %v3413_v58 }
 0x393   :  { %v425_v37 = vmul.f32 %v424_v28, %v420_v33 }
 0x394   :  { %v2700_v39 = vpop.eup %2699  ;;  %v663_v40 = vmul.f32 %v662_v31, %v657_v35  ;;  %v1091_v61 = vrot.slane %v3419_v60, %v1090_v56 }
 0x395   :  { %v3463_v41 = vadd.f32 %v429_v34, %v425_v37  ;;  %v658_v42 = vmul.f32 %v2700_v39, %v644_v62 }
 0x396   :  { %v3465_v43 = vadd.f32 %v668_v36, %v663_v40 }
 0x397   :  { %v1107_v44 = vrot.slane %v3463_v41, %v3461_v38  ;;  %v664_v45 = vmul.f32 %v662_v31, %v658_v42 }
 0x398   :  { %2357 = vmatpush3.xpose.msra.mxu0 %v3465_v43 }
 0x399   :  { %v1115_v46 = vrot.slane %v1107_v44, %v3461_v38  ;;  %2361 = vmatprep.subr.mxu0 %v3079_v1  ;;  %v3472_v47 = vadd.f32 %v668_v36, %v664_v45  ;;  %v1108_v48 = vcombine.high %v1107_v44, %v1107_v44 }
 0x39b   :  { %2359 = vmatmul.mubr.f32.vlgmr.msra.gmra.mrb[8].mxu0 %v1115_v46  ;;  %v1122_v49 = vrot.slane %v1108_v48, %v3461_v38 }
 0x39c   :  { %2362 = vmatpush3.xpose.msra.mxu0 %v3472_v47  ;;  %2363 = vmatprep.mubr.msk.f32.mxu0 %vm3078_vm0, %v3079_v1 }
 0x39d   :  { %2366 = vmatprep.subr.mxu0 %v3079_v1 }
 0x39f   :  { %2364 = vmatmul.mubr.f32.vlgmr.msra.gmra.mrb[10].mxu0 %v1122_v49 }
 0x3a0   :  { %2368 = vmatprep.mubr.msk.f32.mxu0 %vm3078_vm0, %v3079_v1 }
 0x411   :  { %v1079_v50 = vpop.xlane.xlu0 %1078 }
 0x412   :  { %v1081_v51 = vmul.f32 0.0078125, %v1079_v50  ;;  %v1077_v52 = vpop.xlane.xlu1 %1076 }
 0x413   :  { %v1080_v53 = vmul.f32 0.0078125, %v1077_v52 }
 0x414   :  { %v1083_v54 = vadd.f32 1e-12, %v1081_v51 }
 0x415   :  { %v1082_v55 = vadd.f32 1e-12, %v1080_v53 }
 0x416   :  { %2701 = vrsqrt.f32 %v1083_v54 }
 0x417   :  { %2703 = vrsqrt.f32 %v1082_v55 }
 0x420   :  { %v2702_v62 = vpop.eup %2701 }
 0x421   :  { %v2704_v63 = vpop.eup %2703  ;;  %v1087_v3 = vmul.f32 %v2702_v62, %v3440_v9  ;;  %v1800_v62 = vld [vmem:[#allocation17] sm:$0xff] }
 0x422   :  { %v1086_v5 = vmul.f32 %v2704_v63, %v3442_v10  ;;  %v1409_v10 = vld [vmem:[%s3616_s16] sm:$0x3]  ;;  %v1801_v63 = vld [vmem:[#allocation17 + $0x8] sm:$0xff]  ;;  %s3081_s16 = smov [#allocation23]  }
 0x423   :  { %v1093_v6 = vmul.f32 %v1091_v61, %v1087_v3  ;;  %vm1410_vm6 = vcmp.gt.f32.partialorder %v1409_v10, 0.5  ;;  %v1784_v3 = vld [vmem:[#allocation16] sm:$0xff]  ;;  %s2008_s17 = sshll.u32 %s3081_s16, 4  ;;  %s2009_s17 = int_to_ptr.vmem [resolvable:$true] %s2008_s17 }
 0x424   :  { %v1092_v7 = vmul.f32 %v1091_v61, %v1086_v5  ;;  %v1785_v5 = vld [vmem:[#allocation16 + $0x8] sm:$0xff]  ;;  %v1804_v10 = vld [vmem:[#allocation17 + $0x20] sm:$0xff]  ;;  %s2977_s14 = scalar_lea.vmem %s2009_s17, 32  ;;  %p2982_p13 = scmp.lt.s32.totalorder %s2009_s17, %s2009_s17 }
 0x425   :  { %v1099_v8 = vadd.f32 %v1097_v2, %v1093_v6  ;;  %p2978_p12 = scmp.ne.s32.totalorder %s2009_s17, %s2977_s14  ;;  %p2983_p0 = scmp.lt.s32.totalorder %s2977_s14, %s2977_s14 }
 0x426   :  { %v1098_v11 = vadd.f32 %v1097_v2, %v1092_v7  ;;  %v1802_v7 = vld [vmem:[#allocation17 + $0x10] sm:$0xff] }
 0x427   :  { %2372 = vmatpush3.xpose.msra.mxu1 %v1099_v8  ;;  %p2984_p1 = por %p2983_p0, %p2982_p13 }
 0x428   :  { %2367 = vmatpush3.xpose.msra.mxu0 %v1098_v11  ;;  %2381 = vmatprep.subr.mxu1 %v3079_v1 }
 0x429   :  { %2376 = vmatprep.subr.mxu0 %v3079_v1  ;;  %p2985_p2 = pnand %p2984_p1, %p2978_p12 }
 0x42a   :  { %2374 = vmatmul.mubr.f32.vlgmr.msra.gmra.mrb[10].mxu1 %v1122_v49 }
 0x42b   :  { %2369 = vmatmul.mubr.f32.vlgmr.msra.gmra.mrb[12].mxu0 %v1115_v46  ;;  %2382 = vmatpush3.msra.mxu1 %v1099_v8  ;;  %v1803_v8 = vld [vmem:[#allocation17 + $0x18] sm:$0xff] }
 0x42c   :  { %2377 = vmatpush3.msra.mxu0 %v1098_v11  ;;  %2378 = vmatprep.mubr.msk.f32.mxu0 %vm3078_vm0, %v3079_v1  ;;  %v2639_v11 = vpack.c.bf16 %v1785_v5, %v1784_v3 }
 0x42d   :  { %2386 = vmatprep.subr.mxu0 %v3079_v1  ;;  %2383 = vmatprep.mubr.msk.f32.mxu1 %vm3078_vm0, %v3079_v1 }
 0x42e   :  { %2391 = vmatprep.subr.mxu1 %v3079_v1 }
 0x46e   :  { %v1191_v59 = vpop.f32.mrb[8].mxu0 }
 0x46f   :  { %v2360_v60 = vpop.f32.mrb[9].mxu0  ;;  %v1265_v14 = vmul.f32 0.088388346, %v1191_v59 }
 0x470   :  { %v1786_v60 = vld [vmem:[#allocation16 + $0x10] sm:$0xff] }
 0x472   :  { %v1261_v9 = vpop.f32.mrb[10].mxu0 }
 0x473   :  { %v1266_v12 = vmul.f32 0.088388346, %v1261_v9  ;;  %v2365_v13 = vpop.f32.mrb[11].mxu0  ;;  %v2618_v9 = vpack.c.bf16 %v1803_v8, %v1802_v7 }
 0x475   :  { %v1413_v15 = vrot.slane %v1266_v12, 7  ;;  %v1805_v12 = vld [vmem:[#allocation17 + $0x28] sm:$0xff] }
 0x477   :  { %v1414_v16 = vsel %vm327_vm2, %v1413_v15, %v1265_v14  ;;  %v1789_v14 = vld [vmem:[#allocation16 + $0x28] sm:$0xff]  ;;  %v2621_v15 = vpack.c.bf16 %v1805_v12, %v1804_v10 }
 0x478   :  { %v1416_v17 = vsel %vm1410_vm6, %v1414_v16, -1e+09  ;;  %v1806_v16 = vld [vmem:[#allocation17 + $0x30] sm:$0xff] }
 0x479   :  { %v1426_v18 = vsel %vm1425_vm7, %v1416_v17, -inf  ;;  %1990 = vst.msk [vmem:[#allocation23] sm:$0x3] %vm1425_vm7, %v1416_v17 }
 0x47a   :  { %1427 = vmax.xlane.f32.xlu0 %v1426_v18 }
 0x4fd   :  { %v1403_v19 = vpop.f32.mrb[10].mxu1 }
 0x4fe   :  { %v1408_v21 = vmul.f32 0.088388346, %v1403_v19  ;;  %v1333_v23 = vpop.f32.mrb[12].mxu0  ;;  %v2375_v24 = vpop.f32.mrb[11].mxu1  ;;  %v1790_v19 = vld [vmem:[#allocation16 + $0x30] sm:$0xff] }
 0x4ff   :  { %v1407_v25 = vmul.f32 0.088388346, %v1333_v23  ;;  %v2370_v27 = vpop.f32.mrb[13].mxu0  ;;  %v1809_v23 = vld [vmem:[#allocation17 + $0x48] sm:$0xff]  ;;  %v2648_v24 = vpack.c.bf16 %v1791_v20, %v1790_v19 }
 0x500   :  { %v1421_v28 = vrot.slane %v1408_v21, 7  ;;  %v1793_v27 = vld [vmem:[#allocation16 + $0x48] sm:$0xff] }
 0x502   :  { %v1422_v29 = vsel %vm327_vm2, %v1421_v28, %v1407_v25  ;;  %v1792_v25 = vld [vmem:[#allocation16 + $0x40] sm:$0xff] }
 0x503   :  { %v1424_v30 = vsel %vm1418_vm8, %v1422_v29, -1e+09  ;;  %v1810_v29 = vld [vmem:[#allocation17 + $0x50] sm:$0xff] }
 0x504   :  { %v1429_v31 = vsel %vm1425_vm7, %v1424_v30, -inf  ;;  %1991 = vst.msk [vmem:[#allocation25] sm:$0x3] %vm1425_vm7, %v1424_v30 }
 0x505   :  { %1430 = vmax.xlane.f32.xlu1 %v1429_v31  ;;  %v2651_v31 = vpack.c.bf16 %v1793_v27, %v1792_v25 }
 0x507   :  { %v1428_v32 = vpop.xlane.xlu0 %1427 }
 0x592   :  { %v1431_v33 = vpop.xlane.xlu1 %1430 }
 0x593   :  { %v1432_v34 = vmax.f32 %v1428_v32, %v1431_v33  ;;  %v1794_v32 = vld [vmem:[#allocation16 + $0x50] sm:$0xff]  ;;  %v1795_v33 = vld [vmem:[#allocation16 + $0x58] sm:$0xff] }
 0x595   :  { %v1433_v35 = vsub.f32 %v1416_v17, %v1432_v34  ;;  %v1436_v36 = vsub.f32 %v1424_v30, %v1432_v34  ;;  %v1807_v17 = vld [vmem:[#allocation17 + $0x38] sm:$0xff] }
 0x596   :  { %v2624_v21 = vpack.c.bf16 %v1807_v17, %v1806_v16  ;;  %v1811_v30 = vld [vmem:[#allocation17 + $0x58] sm:$0xff] }
 0x597   :  { %v1434_v37 = vmul.f32 1.442695, %v1433_v35  ;;  %v1437_v39 = vmul.f32 1.442695, %v1436_v36  ;;  %v2630_v34 = vpack.c.bf16 %v1811_v30, %v1810_v29  ;;  %v1812_v35 = vld [vmem:[#allocation17 + $0x60] sm:$0xff]  ;;  %v1813_v36 = vld [vmem:[#allocation17 + $0x68] sm:$0xff] }
 0x599   :  { %2705 = vpow2.f32 %v1434_v37  ;;  %v2654_v37 = vpack.c.bf16 %v1795_v33, %v1794_v32 }
 0x59a   :  { %2707 = vpow2.f32 %v1437_v39  ;;  %v1796_v39 = vld [vmem:[#allocation16 + $0x60] sm:$0xff] }
 0x5a3   :  { %v2706_v40 = vpop.eup %2705 }
 0x5a4   :  { %v2708_v42 = vpop.eup %2707  ;;  %v1439_v44 = vsel %vm1425_vm7, %v2706_v40, 0.0 }
 0x5a5   :  { %v1442_v45 = vsel %vm1425_vm7, %v2708_v42, 0.0  ;;  %1440 = vadd.xlane.f32.xlu0 %v1439_v44 }
 0x5a6   :  { %1443 = vadd.xlane.f32.xlu1 %v1442_v45  ;;  %v1798_v45 = vld [vmem:[#allocation16 + $0x70] sm:$0xff] }
 0x632   :  { %v1441_v46 = vpop.xlane.xlu0 %1440 }
 0x633   :  { %v1444_v48 = vpop.xlane.xlu1 %1443 }
 0x634   :  { %v1445_v49 = vadd.f32 %v1444_v48, %v1441_v46  ;;  %v1799_v46 = vld [vmem:[#allocation16 + $0x78] sm:$0xff] }
 0x635   :  { %v2660_v48 = vpack.c.bf16 %v1799_v46, %v1798_v45 }
 0x636   :  { %2709 = vrcp.f32 %v1445_v49  ;;  %v1814_v49 = vld [vmem:[#allocation17 + $0x70] sm:$0xff] }
 0x640   :  { %v2710_v50 = vpop.eup %2709 }
 0x641   :  { %v1448_v51 = vmul.f32 %v2710_v50, %v2708_v42  ;;  %v1447_v52 = vmul.f32 %v2710_v50, %v2706_v40  ;;  %v1797_v40 = vld [vmem:[#allocation16 + $0x68] sm:$0xff]  ;;  %v2633_v42 = vpack.c.bf16 %v1813_v36, %v1812_v35  ;;  %v1815_v50 = vld [vmem:[#allocation17 + $0x78] sm:$0xff] }
 0x642   :  { %v2657_v44 = vpack.c.bf16 %v1797_v40, %v1796_v39 }
 0x643   :  { %v1479_v53 = vrot.slane %v1448_v51, %v3461_v38  ;;  %v1456_v61 = vrot.slane %v1447_v52, %v3461_v38  ;;  %v2636_v51 = vpack.c.bf16 %v1815_v50, %v1814_v49 }
 0x645   :  { %v1487_v54 = vrot.slane %v1479_v53, %v3461_v38  ;;  %v1480_v55 = vcombine.high %v1479_v53, %v1479_v53  ;;  %v1457_v2 = vcombine.high %v1456_v61, %v1456_v61  ;;  %v1464_v6 = vrot.slane %v1456_v61, %v3461_v38 }
 0x647   :  { %2379 = vmatmul.mubr.msk.f32.vlgmr.msra.gmra.mrb[14].mxu0 %vm1495_vm9, %v1487_v54  ;;  %v1494_v56 = vrot.slane %v1480_v55, %v3461_v38  ;;  %v1471_v59 = vrot.slane %v1457_v2, %v3461_v38  ;;  %v1788_v38 = vld [vmem:[#allocation16 + $0x20] sm:$0xff] }
 0x648   :  { %2387 = vmatpush3.msra.mxu0 %v3465_v43  ;;  %2388 = vmatprep.mubr.msk.f32.mxu0 %vm3078_vm0, %v3079_v1  ;;  %v2615_v43 = vpack.c.bf16 %v1801_v63, %v1800_v62  ;;  %v2645_v18 = vpack.c.bf16 %v1789_v14, %v1788_v38 }
 0x649   :  { %2384 = vmatmul.mubr.msk.f32.vlgmr.msra.gmra.mrb[12].mxu1 %vm1495_vm9, %v1494_v56  ;;  %2614 = vmatprep.subr.bf16.mxu0 %v3077_v0 }
 0x64a   :  { %2392 = vmatpush3.msra.mxu1 %v3472_v47  ;;  %2393 = vmatprep.mubr.msk.f32.mxu1 %vm3078_vm0, %v3079_v1  ;;  %v1787_v47 = vld [vmem:[#allocation16 + $0x18] sm:$0xff] }
 0x64b   :  { %2638 = vmatprep.subr.bf16.mxu1 %v3077_v0  ;;  %v2642_v13 = vpack.c.bf16 %v1787_v47, %v1786_v60 }
 0x64f   :  { %2389 = vmatmul.mubr.msk.f32.vlgmr.msra.gmra.mrb[14].mxu0 %vm1495_vm9, %v1464_v6 }
 0x650   :  { %2616 = vmatpush3.bf16.msra.mxu0 %v2615_v43  ;;  %2428 = vmatprep.mubr.msk.f32.mxu0 %vm3078_vm0, %v3079_v1 }
 0x651   :  { %2394 = vmatmul.mubr.msk.f32.vlgmr.msra.gmra.mrb[12].mxu1 %vm1495_vm9, %v1471_v59  ;;  %2617 = vmatprep.subr.bf16.mxu0 %v3077_v0 }
 0x652   :  { %2640 = vmatpush3.bf16.msra.mxu1 %v2639_v11  ;;  %2463 = vmatprep.mubr.msk.f32.mxu1 %vm3078_vm0, %v3079_v1  ;;  %v1808_v1 = vld [vmem:[#allocation17 + $0x40] sm:$0xff] }
 0x653   :  { %2641 = vmatprep.subr.bf16.mxu1 %v3077_v0  ;;  %v2627_v28 = vpack.c.bf16 %v1809_v23, %v1808_v1 }
 0x654   :  { %2619 = vmatpush3.bf16.msra.mxu0 %v2618_v9 }
 0x655   :  { %2620 = vmatprep.subr.bf16.mxu0 %v3077_v0 }
 0x656   :  { %2643 = vmatpush3.bf16.msra.mxu1 %v2642_v13 }
 0x657   :  { %2644 = vmatprep.subr.bf16.mxu1 %v3077_v0 }
 0x658   :  { %2622 = vmatpush3.bf16.msra.mxu0 %v2621_v15 }
 0x659   :  { %2623 = vmatprep.subr.bf16.mxu0 %v3077_v0 }
 0x65a   :  { %2646 = vmatpush3.bf16.msra.mxu1 %v2645_v18 }
 0x65b   :  { %2647 = vmatprep.subr.bf16.mxu1 %v3077_v0 }
 0x65c   :  { %2625 = vmatpush3.bf16.msra.mxu0 %v2624_v21 }
 0x65d   :  { %2626 = vmatprep.subr.bf16.mxu0 %v3077_v0 }
 0x65e   :  { %2649 = vmatpush3.bf16.msra.mxu1 %v2648_v24 }
 0x65f   :  { %2650 = vmatprep.subr.bf16.mxu1 %v3077_v0 }
 0x660   :  { %2628 = vmatpush3.bf16.msra.mxu0 %v2627_v28 }
 0x661   :  { %2629 = vmatprep.subr.bf16.mxu0 %v3077_v0 }
 0x662   :  { %2652 = vmatpush3.bf16.msra.mxu1 %v2651_v31 }
 0x663   :  { %2653 = vmatprep.subr.bf16.mxu1 %v3077_v0 }
 0x664   :  { %2631 = vmatpush3.bf16.msra.mxu0 %v2630_v34 }
 0x665   :  { %2632 = vmatprep.subr.bf16.mxu0 %v3077_v0 }
 0x666   :  { %2655 = vmatpush3.bf16.msra.mxu1 %v2654_v37 }
 0x667   :  { %2656 = vmatprep.subr.bf16.mxu1 %v3077_v0 }
 0x668   :  { %2634 = vmatpush3.bf16.msra.mxu0 %v2633_v42 }
 0x669   :  { %2635 = vmatprep.subr.bf16.mxu0 %v3077_v0 }
 0x66a   :  { %2658 = vmatpush3.bf16.msra.mxu1 %v2657_v44 }
 0x66b   :  { %2659 = vmatprep.subr.bf16.mxu1 %v3077_v0  ;;  %v1964_v0 = vrot.slane %v3485_v57, %v423_v22 }
 0x66c   :  { %2637 = vmatpush3.bf16.msra.mxu0 %v2636_v51 }
 0x66e   :  { %2661 = vmatpush3.bf16.msra.mxu1 %v2660_v48 }
 0x671   :  { %2464 = vmatmul.mubr.f32.vlgmr.msra.gmra.mrb[14].mxu1 %v3463_v41 }
 0x722   :  { %v1708_v52 = vpop.f32.mrb[14].mxu0 }
 0x723   :  { %v2390_v53 = vpop.f32.mrb[15].mxu0 }
 0x724   :  { %v1780_v54 = vpop.f32.mrb[12].mxu1 }
 0x725   :  { %v1818_v55 = vrot.slane %v1780_v54, 7  ;;  %v2395_v56 = vpop.f32.mrb[13].mxu1 }
 0x727   :  { %v1819_v61 = vsel %vm327_vm2, %v1818_v55, %v1708_v52 }
 0x728   :  { %2429 = vmatmul.mubr.f32.vlgmr.msra.gmra.mrb[16].mxu0 %v1819_v61 }
 0x744   :  { %v1957_v62 = vpop.f32.mrb[14].mxu1 }
 0x745   :  { %v2465_v63 = vpop.f32.mrb[15].mxu1 }
 0x7fb   :  { %v1887_v2 = vpop.f32.mrb[16].mxu0 }
 0x7fc   :  { %v1958_v41 = vadd.f32 %v1957_v62, %v1887_v2  ;;  %v2430_v3 = vpop.f32.mrb[17].mxu0 }
 0x7fe   :  { %v1965_v5 = vadd.f32 %v1964_v0, %v1958_v41 }
 0x800   :  { %v1966_v43 = vsel %vm406_vm5, %v1965_v5, 0.0 }
 0x801   :  { %1967 = vadd.xlane.f32.xlu0 %v1966_v43 }
 0x88e   :  { %v1968_v6 = vpop.xlane.xlu0 %1967 }
 0x88f   :  { %v1969_v7 = vmul.f32 0.0078125, %v1968_v6 }
 0x891   :  { %v1970_v8 = vsub.f32 %v1965_v5, %v1969_v7 }
 0x893   :  { %v1971_v11 = vmul.f32 %v1970_v8, %v1970_v8 }
 0x895   :  { %v1972_v59 = vsel %vm406_vm5, %v1971_v11, 0.0 }
 0x896   :  { %1973 = vadd.xlane.f32.xlu1 %v1972_v59 }
 0x897   :  { %2988 = shalt.err (!%p2985_p2)
}
 0x898   :  { %s3642_s3 = sld [smem:[#allocation41_spill]] }
 0x89e   :  { %s2989_s27 = scalar_lea.hbm %s3642_s3, 32 }
 0x89f   :  { %p2990_p3 = scmp.ne.s32.totalorder %s3642_s3, %s2989_s27  ;;  %p2993_p4 = scmp.lt.u32.totalorder %s2989_s27, %s3642_s3 }
 0x8a1   :  { %p2995_p5 = pnand %p2993_p4, %p2990_p3 }
 0x8a3   :  { %2998 = shalt.err (!%p2995_p5)
}
 0x8a4   :  { %2011 = dma.vmem_to_hbm [thread:$0]  %s2009_s17, 32, %s3642_s3, [#allocation24]  }
 0x8a5   :  { %s3082_s9 = smov [#allocation25]  }
 0x8a6   :  { %s2018_s29 = sshll.u32 %s3082_s9, 4  ;;  %s2019_s29 = int_to_ptr.vmem [resolvable:$true] %s2018_s29 }
 0x8a7   :  { %s2999_s30 = scalar_lea.vmem %s2019_s29, 32  ;;  %p3004_p7 = scmp.lt.s32.totalorder %s2019_s29, %s2019_s29 }
 0x8a8   :  { %p3000_p6 = scmp.ne.s32.totalorder %s2019_s29, %s2999_s30  ;;  %p3005_p8 = scmp.lt.s32.totalorder %s2999_s30, %s2999_s30 }
 0x8aa   :  { %p3006_p9 = por %p3005_p8, %p3004_p7 }
 0x8ac   :  { %p3007_p10 = pnand %p3006_p9, %p3000_p6 }
 0x8ae   :  { %3010 = shalt.err (!%p3007_p10)
}
 0x8af   :  { %s3643_s20 = sld [smem:[#allocation42_spill]] }
 0x8b5   :  { %s3011_s1 = scalar_lea.hbm %s3643_s20, 32 }
 0x8b6   :  { %p3012_p11 = scmp.ne.s32.totalorder %s3643_s20, %s3011_s1  ;;  %p3015_p12 = scmp.lt.u32.totalorder %s3011_s1, %s3643_s20 }
 0x8b8   :  { %p3017_p13 = pnand %p3015_p12, %p3012_p11 }
 0x8ba   :  { %3020 = shalt.err (!%p3017_p13)
}
 0x8bb   :  { %2021 = dma.vmem_to_hbm [thread:$0]  %s2019_s29, 32, %s3643_s20, [#allocation24]   ;;  %v1982_v9 = vrot.slane %v3485_v57, %v428_v26  ;;  %v1987_v13 = vrot.slane %v3485_v57, %v479_v4 }
 0x8bc   :  { %s3083_s26 = smov [#allocation22]  }
 0x8bd   :  { %s1998_s12 = sshll.u32 %s3083_s26, 4  ;;  %s1999_s12 = int_to_ptr.vmem [resolvable:$true] %s1998_s12 }
 0x8be   :  { %s3021_s8 = scalar_lea.vmem %s1999_s12, 32  ;;  %p3026_p1 = scmp.lt.s32.totalorder %s1999_s12, %s1999_s12 }
 0x8bf   :  { %p3022_p0 = scmp.ne.s32.totalorder %s1999_s12, %s3021_s8  ;;  %p3027_p2 = scmp.lt.s32.totalorder %s3021_s8, %s3021_s8 }
 0x8c1   :  { %p3028_p3 = por %p3027_p2, %p3026_p1 }
 0x8c3   :  { %p3029_p4 = pnand %p3028_p3, %p3022_p0 }
 0x923   :  { %v1974_v22 = vpop.xlane.xlu1 %1973 }
 0x924   :  { %v1975_v60 = vmul.f32 0.0078125, %v1974_v22 }
 0x926   :  { %v1976_v47 = vadd.f32 1e-12, %v1975_v60 }
 0x928   :  { %2711 = vrsqrt.f32 %v1976_v47 }
 0x932   :  { %v2712_v10 = vpop.eup %2711 }
 0x933   :  { %v1978_v12 = vmul.f32 %v2712_v10, %v1970_v8 }
 0x935   :  { %v1983_v38 = vmul.f32 %v1982_v9, %v1978_v12 }
 0x937   :  { %v1988_v14 = vadd.f32 %v1987_v13, %v1983_v38 }
 0x939   :  { %1989 = vst [vmem:[#allocation22] sm:$0x3] %v1988_v14 }
 0x93a   :  { %3032 = shalt.err (!%p3029_p4)
}
 0x93b   :  { %s3644_s16 = sld [smem:[#allocation40_spill]] }
 0x941   :  { %s3033_s17 = scalar_lea.hbm %s3644_s16, 32 }
 0x942   :  { %p3034_p5 = scmp.ne.s32.totalorder %s3644_s16, %s3033_s17  ;;  %p3037_p6 = scmp.lt.u32.totalorder %s3033_s17, %s3644_s16 }
 0x944   :  { %p3039_p7 = pnand %p3037_p6, %p3034_p5 }
 0x946   :  { %3042 = shalt.err (!%p3039_p7)
}
 0x947   :  { %2001 = dma.vmem_to_hbm [thread:$0]  %s1999_s12, 32, %s3644_s16, [#allocation4]  }
 0x948   :  { %3057 = dma.done.wait [#allocation4], 32  }
 0x949   :  { %3058 = vsyncadd [#allocation4], 4294967264 }
 0x94a   :  { %3059 = dma.done.wait [#allocation24], 64  }
 0x94b   :  { %3060 = vsyncadd [#allocation24], 4294967232 }
 0x94c   :  { %2031 = vsyncpa [#allocation3], 1 }
 0x94d   :  { %2032 = vsyncpa [#allocation6], 1 }
 0x94e   :  { %2033 = vsyncpa [#allocation9], 1 }
 0x94f   :  { %2034 = vsyncpa [#allocation12], 1 }
 0x950   :  { %2035 = vsyncpa [#allocation15], 1 }
 0x951   :  { %2036 = vsyncpa [#allocation18], 1 }
 0x952   :  { %2037 = vsyncpa [#allocation21], 1 }
 0x953   :  { %2038 = vsyncpa [#allocation4], 1 }
 0x954   :  { %2039 = vsyncpa [#allocation24], 1 }

</bundles_post_ra>
